<compile_context>
chip_gen: v5e
topology: v5e:2x2
jax: 0.10.0
libtpu: 0.0.40
codegen_flags: <defaults>
</compile_context>

<pallas_src>
import math

import numpy as np
import jax
import jax.numpy as jnp
from jax.experimental import pallas as pl
from jax.experimental.pallas import tpu as pltpu


# ----------------------------- fused Block kernel ------------------------------

def block_kernel(x_ref, t1_ref, t2_ref, bd3_ref, cw1_ref, cw2_ref, cw3_ref,
                 bias_ref, o_ref):
    # x_ref   : (1, H, W*C)   lane-dense activation for one image
    # t1_ref  : (3, W*C, W*C) Toeplitz-expanded b1.conv1 (per ky tap)
    # t2_ref  : (3, W*C, W*C) Toeplitz-expanded b1.conv2
    # bd3_ref : (W*C, W*C)    block-diagonal b1.conv3 (1x1)
    # cw1_ref : (2, W*C, W*C) split block-diagonal c1 weight ([c0, b1] chunks)
    # cw2_ref : (3, W*C, W*C) split block-diagonal c2 weight ([c0, b1, b2])
    # cw3_ref : (4, W*C, W*C) split block-diagonal c3 weight ([c0, b1, b2, b3])
    # bias_ref: (8, W*C)      tiled biases [b1_b1,b1_b2,b1_b3,c1_b,c2_b,c3_b,0,0]
    # o_ref   : (1, H, W*C)
    H = x_ref.shape[1]
    WC = x_ref.shape[2]
    f32 = jnp.float32

    x = x_ref[...].reshape(H, WC).astype(f32)
    bias = bias_ref[...]                                 # (8, WC)

    # Exact 0/1 row-shift operators as tiny (H,H) matmuls:
    #   shift_down(P)[h] = P[h-1] (row 0 -> 0), shift_up(P)[h] = P[h+1].
    r = jax.lax.broadcasted_iota(jnp.int32, (H, H), 0)
    c = jax.lax.broadcasted_iota(jnp.int32, (H, H), 1)
    d_dn = (c == r - 1).astype(f32)
    d_up = (c == r + 1).astype(f32)

    def mm(a, b):
        return jnp.dot(a, b, preferred_element_type=f32)

    def conv3x3_relu(a, t_ref, b):
        # out = shift_down(a @ T0) + a @ T1 + shift_up(a @ T2) + bias
        p0 = mm(a, t_ref[0])
        p1 = mm(a, t_ref[1])
        p2 = mm(a, t_ref[2])
        out = mm(d_dn, p0) + p1 + mm(d_up, p2) + b
        return jnp.maximum(out, 0.0)

    def eres(a):
        # conv3x3+ReLU -> conv3x3+ReLU -> conv1x1 ; ReLU(out + a)
        h = conv3x3_relu(a, t1_ref, bias[0:1, :])
        h = conv3x3_relu(h, t2_ref, bias[1:2, :])
        h = mm(h, bd3_ref[...]) + bias[2:3, :] + a
        return jnp.maximum(h, 0.0)

    b1 = eres(x)
    o1 = jnp.maximum(mm(x, cw1_ref[0]) + mm(b1, cw1_ref[1])
                     + bias[3:4, :], 0.0)
    b2 = eres(o1)
    o2 = jnp.maximum(mm(x, cw2_ref[0]) + mm(b1, cw2_ref[1]) + mm(b2, cw2_ref[2])
                     + bias[4:5, :], 0.0)
    b3 = eres(o2)
    o3 = jnp.maximum(mm(x, cw3_ref[0]) + mm(b1, cw3_ref[1]) + mm(b2, cw3_ref[2])
                     + mm(b3, cw3_ref[3]) + bias[5:6, :], 0.0)

    o_ref[...] = o3.reshape(1, H, WC).astype(o_ref.dtype)


# ----------------------------- weight expansion (exact, outside kernel) --------

def _shift_select(Wsp):
    # S[dx, s, w] = 1 iff s == w + dx - 1 (valid column taps of a pad-1 3x3 conv)
    S = np.zeros((3, Wsp, Wsp), np.float32)
    for dx in range(3):
        for w in range(Wsp):
            s = w + dx - 1
            if 0 <= s < Wsp:
                S[dx, s, w] = 1.0
    return S


def _toeplitz3(wconv, S):
    # wconv: (3,3,Cin,Cout) HWIO -> (3, W*Cin, W*Cout), one matrix per ky tap.
    # T[ky, s*Cin+ci, w*Cout+co] = sum_dx [s == w+dx-1] * wconv[ky, dx, ci, co]
    Wsp = S.shape[1]
    _, _, Cin, Cout = wconv.shape
    a = S[None, :, :, None, :, None]            # (1, 3, W, 1, W, 1)
    b = wconv[:, :, None, :, None, :]           # (3, 3, 1, Cin, 1, Cout)
    t = (a * b).sum(axis=1)                     # (3, W, Cin, W, Cout)  (exact f32)
    return t.reshape(3, Wsp * Cin, Wsp * Cout)


def _blockdiag(w1, Wsp):
    # w1: (Cin, Cout) -> block-diagonal (W*Cin, W*Cout)
    Cin, Cout = w1.shape
    eye = jnp.eye(Wsp, dtype=w1.dtype)
    bd = eye[:, None, :, None] * w1[None, :, None, :]    # (W, Cin, W, Cout)
    return bd.reshape(Wsp * Cin, Wsp * Cout)


# ----------------------------- Block forward ----------------------------------

@jax.jit
def block_forward(x, p):
    """CARN Block forward.  x: (N, H, W, nf) NHWC."""
    N, H, Wsp, C = x.shape
    WC = Wsp * C

    S = jnp.asarray(_shift_select(Wsp))
    T1 = _toeplitz3(p["b1_w1"], S)
    T2 = _toeplitz3(p["b1_w2"], S)
    BD3 = _blockdiag(p["b1_w3"], Wsp)
    CW1 = jnp.stack([_blockdiag(p["c1_w"][k * C:(k + 1) * C], Wsp) for k in range(2)])
    CW2 = jnp.stack([_blockdiag(p["c2_w"][k * C:(k + 1) * C], Wsp) for k in range(3)])
    CW3 = jnp.stack([_blockdiag(p["c3_w"][k * C:(k + 1) * C], Wsp) for k in range(4)])
    zb = jnp.zeros((WC,), x.dtype)
    BIAS = jnp.stack([
        jnp.tile(p["b1_b1"], Wsp), jnp.tile(p["b1_b2"], Wsp), jnp.tile(p["b1_b3"], Wsp),
        jnp.tile(p["c1_b"], Wsp), jnp.tile(p["c2_b"], Wsp), jnp.tile(p["c3_b"], Wsp),
        zb, zb])                                          # (8, WC)

    xf = x.reshape(N, H, WC)                              # lane-dense, no copy
    out = pl.pallas_call(
        block_kernel,
        out_shape=jax.ShapeDtypeStruct((N, H, WC), x.dtype),
        grid=(N,),
        in_specs=[
            pl.BlockSpec((1, H, WC), lambda n: (n, 0, 0)),
            pl.BlockSpec((3, WC, WC), lambda n: (0, 0, 0)),
            pl.BlockSpec((3, WC, WC), lambda n: (0, 0, 0)),
            pl.BlockSpec((WC, WC), lambda n: (0, 0)),
            pl.BlockSpec((2, WC, WC), lambda n: (0, 0, 0)),
            pl.BlockSpec((3, WC, WC), lambda n: (0, 0, 0)),
            pl.BlockSpec((4, WC, WC), lambda n: (0, 0, 0)),
            pl.BlockSpec((8, WC), lambda n: (0, 0)),
        ],
        out_specs=pl.BlockSpec((1, H, WC), lambda n: (n, 0, 0)),
        compiler_params=pltpu.CompilerParams(
            dimension_semantics=("parallel",)),
    )(xf, T1, T2, BD3, CW1, CW2, CW3, BIAS)
    return out.reshape(N, H, Wsp, C)


# ----------------------------- reference (plain JAX) ---------------------------

def _conv_ref(x, w, b, padding):
    y = jax.lax.conv_general_dilated(
        x, w, window_strides=(1, 1), padding=padding,
        dimension_numbers=("NHWC", "HWIO", "NHWC"))
    return y + b.reshape(1, 1, 1, -1)


def block_forward_ref(x, p):
    def eres(inp):
        h = jax.nn.relu(_conv_ref(inp, p["b1_w1"], p["b1_b1"], "SAME"))
        h = jax.nn.relu(_conv_ref(h, p["b1_w2"], p["b1_b2"], "SAME"))
        h = _conv_ref(h, p["b1_w3"].reshape(1, 1, *p["b1_w3"].shape),
                      p["b1_b3"], "VALID")
        return jax.nn.relu(h + inp)

    def c_blk(inp, w, b):
        return jax.nn.relu(_conv_ref(inp, w.reshape(1, 1, *w.shape), b, "VALID"))

    c0 = o0 = x
    b1 = eres(o0)
    c1 = jnp.concatenate([c0, b1], axis=-1)
    o1 = c_blk(c1, p["c1_w"], p["c1_b"])
    b2 = eres(o1)
    c2 = jnp.concatenate([c1, b2], axis=-1)
    o2 = c_blk(c2, p["c2_w"], p["c2_b"])
    b3 = eres(o2)
    c3 = jnp.concatenate([c2, b3], axis=-1)
    return c_blk(c3, p["c3_w"], p["c3_b"])


# ----------------------------- param init -------------------------------------

def init_params(key, nf):
    keys = jax.random.split(key, 12)

    def uni(k, shape, fan_in):
        bound = 1.0 / math.sqrt(fan_in)
        return jax.random.uniform(k, shape, jnp.float32, -bound, bound)

    return {
        "b1_w1": uni(keys[0], (3, 3, nf, nf), nf * 9),
        "b1_b1": uni(keys[1], (nf,), nf * 9),
        "b1_w2": uni(keys[2], (3, 3, nf, nf), nf * 9),
        "b1_b2": uni(keys[3], (nf,), nf * 9),
        "b1_w3": uni(keys[4], (nf, nf), nf),
        "b1_b3": uni(keys[5], (nf,), nf),
        "c1_w": uni(keys[6], (2 * nf, nf), 2 * nf),
        "c1_b": uni(keys[7], (nf,), 2 * nf),
        "c2_w": uni(keys[8], (3 * nf, nf), 3 * nf),
        "c2_b": uni(keys[9], (nf,), 3 * nf),
        "c3_w": uni(keys[10], (4 * nf, nf), 4 * nf),
        "c3_b": uni(keys[11], (nf,), 4 * nf),
    }


# ----------------------------- main --------------------------------------------

if __name__ == "__main__":
    nf = 8
    N, H, W = 2, 16, 16
    key = jax.random.PRNGKey(0)
    kx, kp = jax.random.split(key)
    x = jax.random.normal(kx, (N, H, W, nf), jnp.float32)   # NHWC
    params = init_params(kp, nf)

    out = block_forward(x, params)
    out = jax.block_until_ready(out)
    assert out.shape == (N, H, W, nf), out.shape

    ref = block_forward_ref(x, params)
    ref = jax.block_until_ready(ref)
    assert jnp.allclose(out, ref, atol=1e-4, rtol=1e-4), \
        float(jnp.max(jnp.abs(out - ref)))

    print("KERNEL_OK")
</pallas_src>

<mosaic_0001>
module attributes {stable_mosaic.version = 11 : i64} {
  func.func @block_kernel(%arg0: i32, %arg1: memref<1x16x128xf32, #tpu.memory_space<vmem>>, %arg2: memref<3x128x128xf32, #tpu.memory_space<vmem>>, %arg3: memref<3x128x128xf32, #tpu.memory_space<vmem>>, %arg4: memref<128x128xf32, #tpu.memory_space<vmem>>, %arg5: memref<2x128x128xf32, #tpu.memory_space<vmem>>, %arg6: memref<3x128x128xf32, #tpu.memory_space<vmem>>, %arg7: memref<4x128x128xf32, #tpu.memory_space<vmem>>, %arg8: memref<8x128xf32, #tpu.memory_space<vmem>>, %arg9: memref<1x16x128xf32, #tpu.memory_space<vmem>>) attributes {dimension_semantics = [#tpu.dimension_semantics<parallel>], iteration_bounds = array<i64: 2>, scalar_prefetch = 0 : i64, scratch_operands = 0 : i64, tpu.core_type = #tpu.core_type<tc>, window_params = [{transform_indices = @transform_0, window_bounds = array<i64: 1, 16, 128>}, {pipeline_mode = #tpu.pipeline_mode<synchronous>, transform_indices = @transform_1, window_bounds = array<i64: 3, 128, 128>}, {pipeline_mode = #tpu.pipeline_mode<synchronous>, transform_indices = @transform_2, window_bounds = array<i64: 3, 128, 128>}, {pipeline_mode = #tpu.pipeline_mode<synchronous>, transform_indices = @transform_3, window_bounds = array<i64: 128, 128>}, {pipeline_mode = #tpu.pipeline_mode<synchronous>, transform_indices = @transform_4, window_bounds = array<i64: 2, 128, 128>}, {pipeline_mode = #tpu.pipeline_mode<synchronous>, transform_indices = @transform_5, window_bounds = array<i64: 3, 128, 128>}, {pipeline_mode = #tpu.pipeline_mode<synchronous>, transform_indices = @transform_6, window_bounds = array<i64: 4, 128, 128>}, {pipeline_mode = #tpu.pipeline_mode<synchronous>, transform_indices = @transform_7, window_bounds = array<i64: 8, 128>}, {transform_indices = @transform_8, window_bounds = array<i64: 1, 16, 128>}]} {
    %c0 = arith.constant 0 : index
    %c0_0 = arith.constant 0 : index
    %c0_1 = arith.constant 0 : index
    %0 = vector.load %arg1[%c0, %c0_0, %c0_1] : memref<1x16x128xf32, #tpu.memory_space<vmem>>, vector<1x16x128xf32>
    %1 = vector.shape_cast %0 : vector<1x16x128xf32> to vector<16x128xf32>
    %c0_2 = arith.constant 0 : index
    %c0_3 = arith.constant 0 : index
    %2 = vector.load %arg8[%c0_2, %c0_3] : memref<8x128xf32, #tpu.memory_space<vmem>>, vector<8x128xf32>
    %3 = tpu.iota {dimensions = array<i32: 0>} : vector<16x16xi32>
    %4 = tpu.iota {dimensions = array<i32: 1>} : vector<16x16xi32>
    %c1_i32 = arith.constant 1 : i32
    %5 = vector.broadcast %c1_i32 : i32 to vector<16x16xi32>
    %6 = arith.subi %3, %5 : vector<16x16xi32>
    %7 = arith.cmpi eq, %4, %6 : vector<16x16xi32>
    %8 = arith.extui %7 : vector<16x16xi1> to vector<16x16xi32>
    %9 = arith.sitofp %8 : vector<16x16xi32> to vector<16x16xf32>
    %c1_i32_4 = arith.constant 1 : i32
    %10 = vector.broadcast %c1_i32_4 : i32 to vector<16x16xi32>
    %11 = arith.addi %3, %10 : vector<16x16xi32>
    %12 = arith.cmpi eq, %4, %11 : vector<16x16xi32>
    %13 = arith.extui %12 : vector<16x16xi1> to vector<16x16xi32>
    %14 = arith.sitofp %13 : vector<16x16xi32> to vector<16x16xf32>
    %15 = vector.extract_strided_slice %2 {offsets = [0, 0], sizes = [1, 128], strides = [1, 1]} : vector<8x128xf32> to vector<1x128xf32>
    %c0_5 = arith.constant 0 : index
    %c0_6 = arith.constant 0 : index
    %c0_7 = arith.constant 0 : index
    %16 = vector.load %arg2[%c0_5, %c0_6, %c0_7] : memref<3x128x128xf32, #tpu.memory_space<vmem>>, vector<1x128x128xf32>
    %17 = vector.shape_cast %16 : vector<1x128x128xf32> to vector<128x128xf32>
    %cst = arith.constant dense<0.000000e+00> : vector<16x128xf32>
    %18 = tpu.matmul %1, %17, %cst {dimension_numbers = #tpu.dot_dimension_numbers<[1], [0], [0], [1], [0, 0, 1, 1], [], []>} : vector<16x128xf32>, vector<128x128xf32>, vector<16x128xf32> -> vector<16x128xf32>
    %c1 = arith.constant 1 : index
    %c0_8 = arith.constant 0 : index
    %c0_9 = arith.constant 0 : index
    %19 = vector.load %arg2[%c1, %c0_8, %c0_9] : memref<3x128x128xf32, #tpu.memory_space<vmem>>, vector<1x128x128xf32>
    %20 = vector.shape_cast %19 : vector<1x128x128xf32> to vector<128x128xf32>
    %cst_10 = arith.constant dense<0.000000e+00> : vector<16x128xf32>
    %21 = tpu.matmul %1, %20, %cst_10 {dimension_numbers = #tpu.dot_dimension_numbers<[1], [0], [0], [1], [0, 0, 1, 1], [], []>} : vector<16x128xf32>, vector<128x128xf32>, vector<16x128xf32> -> vector<16x128xf32>
    %c2 = arith.constant 2 : index
    %c0_11 = arith.constant 0 : index
    %c0_12 = arith.constant 0 : index
    %22 = vector.load %arg2[%c2, %c0_11, %c0_12] : memref<3x128x128xf32, #tpu.memory_space<vmem>>, vector<1x128x128xf32>
    %23 = vector.shape_cast %22 : vector<1x128x128xf32> to vector<128x128xf32>
    %cst_13 = arith.constant dense<0.000000e+00> : vector<16x128xf32>
    %24 = tpu.matmul %1, %23, %cst_13 {dimension_numbers = #tpu.dot_dimension_numbers<[1], [0], [0], [1], [0, 0, 1, 1], [], []>} : vector<16x128xf32>, vector<128x128xf32>, vector<16x128xf32> -> vector<16x128xf32>
    %cst_14 = arith.constant dense<0.000000e+00> : vector<16x128xf32>
    %25 = tpu.matmul %9, %18, %cst_14 {dimension_numbers = #tpu.dot_dimension_numbers<[1], [0], [0], [1], [0, 0, 1, 1], [], []>} : vector<16x16xf32>, vector<16x128xf32>, vector<16x128xf32> -> vector<16x128xf32>
    %26 = arith.addf %25, %21 : vector<16x128xf32>
    %cst_15 = arith.constant dense<0.000000e+00> : vector<16x128xf32>
    %27 = tpu.matmul %14, %24, %cst_15 {dimension_numbers = #tpu.dot_dimension_numbers<[1], [0], [0], [1], [0, 0, 1, 1], [], []>} : vector<16x16xf32>, vector<16x128xf32>, vector<16x128xf32> -> vector<16x128xf32>
    %28 = arith.addf %26, %27 : vector<16x128xf32>
    %29 = vector.broadcast %15 : vector<1x128xf32> to vector<16x128xf32>
    %30 = arith.addf %28, %29 : vector<16x128xf32>
    %cst_16 = arith.constant 0.000000e+00 : f32
    %31 = vector.broadcast %cst_16 : f32 to vector<16x128xf32>
    %32 = arith.maximumf %30, %31 : vector<16x128xf32>
    %33 = vector.extract_strided_slice %2 {offsets = [1, 0], sizes = [1, 128], strides = [1, 1]} : vector<8x128xf32> to vector<1x128xf32>
    %c0_17 = arith.constant 0 : index
    %c0_18 = arith.constant 0 : index
    %c0_19 = arith.constant 0 : index
    %34 = vector.load %arg3[%c0_17, %c0_18, %c0_19] : memref<3x128x128xf32, #tpu.memory_space<vmem>>, vector<1x128x128xf32>
    %35 = vector.shape_cast %34 : vector<1x128x128xf32> to vector<128x128xf32>
    %cst_20 = arith.constant dense<0.000000e+00> : vector<16x128xf32>
    %36 = tpu.matmul %32, %35, %cst_20 {dimension_numbers = #tpu.dot_dimension_numbers<[1], [0], [0], [1], [0, 0, 1, 1], [], []>} : vector<16x128xf32>, vector<128x128xf32>, vector<16x128xf32> -> vector<16x128xf32>
    %c1_21 = arith.constant 1 : index
    %c0_22 = arith.constant 0 : index
    %c0_23 = arith.constant 0 : index
    %37 = vector.load %arg3[%c1_21, %c0_22, %c0_23] : memref<3x128x128xf32, #tpu.memory_space<vmem>>, vector<1x128x128xf32>
    %38 = vector.shape_cast %37 : vector<1x128x128xf32> to vector<128x128xf32>
    %cst_24 = arith.constant dense<0.000000e+00> : vector<16x128xf32>
    %39 = tpu.matmul %32, %38, %cst_24 {dimension_numbers = #tpu.dot_dimension_numbers<[1], [0], [0], [1], [0, 0, 1, 1], [], []>} : vector<16x128xf32>, vector<128x128xf32>, vector<16x128xf32> -> vector<16x128xf32>
    %c2_25 = arith.constant 2 : index
    %c0_26 = arith.constant 0 : index
    %c0_27 = arith.constant 0 : index
    %40 = vector.load %arg3[%c2_25, %c0_26, %c0_27] : memref<3x128x128xf32, #tpu.memory_space<vmem>>, vector<1x128x128xf32>
    %41 = vector.shape_cast %40 : vector<1x128x128xf32> to vector<128x128xf32>
    %cst_28 = arith.constant dense<0.000000e+00> : vector<16x128xf32>
    %42 = tpu.matmul %32, %41, %cst_28 {dimension_numbers = #tpu.dot_dimension_numbers<[1], [0], [0], [1], [0, 0, 1, 1], [], []>} : vector<16x128xf32>, vector<128x128xf32>, vector<16x128xf32> -> vector<16x128xf32>
    %cst_29 = arith.constant dense<0.000000e+00> : vector<16x128xf32>
    %43 = tpu.matmul %9, %36, %cst_29 {dimension_numbers = #tpu.dot_dimension_numbers<[1], [0], [0], [1], [0, 0, 1, 1], [], []>} : vector<16x16xf32>, vector<16x128xf32>, vector<16x128xf32> -> vector<16x128xf32>
    %44 = arith.addf %43, %39 : vector<16x128xf32>
    %cst_30 = arith.constant dense<0.000000e+00> : vector<16x128xf32>
    %45 = tpu.matmul %14, %42, %cst_30 {dimension_numbers = #tpu.dot_dimension_numbers<[1], [0], [0], [1], [0, 0, 1, 1], [], []>} : vector<16x16xf32>, vector<16x128xf32>, vector<16x128xf32> -> vector<16x128xf32>
    %46 = arith.addf %44, %45 : vector<16x128xf32>
    %47 = vector.broadcast %33 : vector<1x128xf32> to vector<16x128xf32>
    %48 = arith.addf %46, %47 : vector<16x128xf32>
    %cst_31 = arith.constant 0.000000e+00 : f32
    %49 = vector.broadcast %cst_31 : f32 to vector<16x128xf32>
    %50 = arith.maximumf %48, %49 : vector<16x128xf32>
    %c0_32 = arith.constant 0 : index
    %c0_33 = arith.constant 0 : index
    %51 = vector.load %arg4[%c0_32, %c0_33] : memref<128x128xf32, #tpu.memory_space<vmem>>, vector<128x128xf32>
    %cst_34 = arith.constant dense<0.000000e+00> : vector<16x128xf32>
    %52 = tpu.matmul %50, %51, %cst_34 {dimension_numbers = #tpu.dot_dimension_numbers<[1], [0], [0], [1], [0, 0, 1, 1], [], []>} : vector<16x128xf32>, vector<128x128xf32>, vector<16x128xf32> -> vector<16x128xf32>
    %53 = vector.extract_strided_slice %2 {offsets = [2, 0], sizes = [1, 128], strides = [1, 1]} : vector<8x128xf32> to vector<1x128xf32>
    %54 = vector.broadcast %53 : vector<1x128xf32> to vector<16x128xf32>
    %55 = arith.addf %52, %54 : vector<16x128xf32>
    %56 = arith.addf %55, %1 : vector<16x128xf32>
    %cst_35 = arith.constant 0.000000e+00 : f32
    %57 = vector.broadcast %cst_35 : f32 to vector<16x128xf32>
    %58 = arith.maximumf %56, %57 : vector<16x128xf32>
    %c0_36 = arith.constant 0 : index
    %c0_37 = arith.constant 0 : index
    %c0_38 = arith.constant 0 : index
    %59 = vector.load %arg5[%c0_36, %c0_37, %c0_38] : memref<2x128x128xf32, #tpu.memory_space<vmem>>, vector<1x128x128xf32>
    %60 = vector.shape_cast %59 : vector<1x128x128xf32> to vector<128x128xf32>
    %cst_39 = arith.constant dense<0.000000e+00> : vector<16x128xf32>
    %61 = tpu.matmul %1, %60, %cst_39 {dimension_numbers = #tpu.dot_dimension_numbers<[1], [0], [0], [1], [0, 0, 1, 1], [], []>} : vector<16x128xf32>, vector<128x128xf32>, vector<16x128xf32> -> vector<16x128xf32>
    %c1_40 = arith.constant 1 : index
    %c0_41 = arith.constant 0 : index
    %c0_42 = arith.constant 0 : index
    %62 = vector.load %arg5[%c1_40, %c0_41, %c0_42] : memref<2x128x128xf32, #tpu.memory_space<vmem>>, vector<1x128x128xf32>
    %63 = vector.shape_cast %62 : vector<1x128x128xf32> to vector<128x128xf32>
    %cst_43 = arith.constant dense<0.000000e+00> : vector<16x128xf32>
    %64 = tpu.matmul %58, %63, %cst_43 {dimension_numbers = #tpu.dot_dimension_numbers<[1], [0], [0], [1], [0, 0, 1, 1], [], []>} : vector<16x128xf32>, vector<128x128xf32>, vector<16x128xf32> -> vector<16x128xf32>
    %65 = arith.addf %61, %64 : vector<16x128xf32>
    %66 = vector.extract_strided_slice %2 {offsets = [3, 0], sizes = [1, 128], strides = [1, 1]} : vector<8x128xf32> to vector<1x128xf32>
    %67 = vector.broadcast %66 : vector<1x128xf32> to vector<16x128xf32>
    %68 = arith.addf %65, %67 : vector<16x128xf32>
    %cst_44 = arith.constant 0.000000e+00 : f32
    %69 = vector.broadcast %cst_44 : f32 to vector<16x128xf32>
    %70 = arith.maximumf %68, %69 : vector<16x128xf32>
    %71 = vector.extract_strided_slice %2 {offsets = [0, 0], sizes = [1, 128], strides = [1, 1]} : vector<8x128xf32> to vector<1x128xf32>
    %c0_45 = arith.constant 0 : index
    %c0_46 = arith.constant 0 : index
    %c0_47 = arith.constant 0 : index
    %72 = vector.load %arg2[%c0_45, %c0_46, %c0_47] : memref<3x128x128xf32, #tpu.memory_space<vmem>>, vector<1x128x128xf32>
    %73 = vector.shape_cast %72 : vector<1x128x128xf32> to vector<128x128xf32>
    %cst_48 = arith.constant dense<0.000000e+00> : vector<16x128xf32>
    %74 = tpu.matmul %70, %73, %cst_48 {dimension_numbers = #tpu.dot_dimension_numbers<[1], [0], [0], [1], [0, 0, 1, 1], [], []>} : vector<16x128xf32>, vector<128x128xf32>, vector<16x128xf32> -> vector<16x128xf32>
    %c1_49 = arith.constant 1 : index
    %c0_50 = arith.constant 0 : index
    %c0_51 = arith.constant 0 : index
    %75 = vector.load %arg2[%c1_49, %c0_50, %c0_51] : memref<3x128x128xf32, #tpu.memory_space<vmem>>, vector<1x128x128xf32>
    %76 = vector.shape_cast %75 : vector<1x128x128xf32> to vector<128x128xf32>
    %cst_52 = arith.constant dense<0.000000e+00> : vector<16x128xf32>
    %77 = tpu.matmul %70, %76, %cst_52 {dimension_numbers = #tpu.dot_dimension_numbers<[1], [0], [0], [1], [0, 0, 1, 1], [], []>} : vector<16x128xf32>, vector<128x128xf32>, vector<16x128xf32> -> vector<16x128xf32>
    %c2_53 = arith.constant 2 : index
    %c0_54 = arith.constant 0 : index
    %c0_55 = arith.constant 0 : index
    %78 = vector.load %arg2[%c2_53, %c0_54, %c0_55] : memref<3x128x128xf32, #tpu.memory_space<vmem>>, vector<1x128x128xf32>
    %79 = vector.shape_cast %78 : vector<1x128x128xf32> to vector<128x128xf32>
    %cst_56 = arith.constant dense<0.000000e+00> : vector<16x128xf32>
    %80 = tpu.matmul %70, %79, %cst_56 {dimension_numbers = #tpu.dot_dimension_numbers<[1], [0], [0], [1], [0, 0, 1, 1], [], []>} : vector<16x128xf32>, vector<128x128xf32>, vector<16x128xf32> -> vector<16x128xf32>
    %cst_57 = arith.constant dense<0.000000e+00> : vector<16x128xf32>
    %81 = tpu.matmul %9, %74, %cst_57 {dimension_numbers = #tpu.dot_dimension_numbers<[1], [0], [0], [1], [0, 0, 1, 1], [], []>} : vector<16x16xf32>, vector<16x128xf32>, vector<16x128xf32> -> vector<16x128xf32>
    %82 = arith.addf %81, %77 : vector<16x128xf32>
    %cst_58 = arith.constant dense<0.000000e+00> : vector<16x128xf32>
    %83 = tpu.matmul %14, %80, %cst_58 {dimension_numbers = #tpu.dot_dimension_numbers<[1], [0], [0], [1], [0, 0, 1, 1], [], []>} : vector<16x16xf32>, vector<16x128xf32>, vector<16x128xf32> -> vector<16x128xf32>
    %84 = arith.addf %82, %83 : vector<16x128xf32>
    %85 = vector.broadcast %71 : vector<1x128xf32> to vector<16x128xf32>
    %86 = arith.addf %84, %85 : vector<16x128xf32>
    %cst_59 = arith.constant 0.000000e+00 : f32
    %87 = vector.broadcast %cst_59 : f32 to vector<16x128xf32>
    %88 = arith.maximumf %86, %87 : vector<16x128xf32>
    %89 = vector.extract_strided_slice %2 {offsets = [1, 0], sizes = [1, 128], strides = [1, 1]} : vector<8x128xf32> to vector<1x128xf32>
    %c0_60 = arith.constant 0 : index
    %c0_61 = arith.constant 0 : index
    %c0_62 = arith.constant 0 : index
    %90 = vector.load %arg3[%c0_60, %c0_61, %c0_62] : memref<3x128x128xf32, #tpu.memory_space<vmem>>, vector<1x128x128xf32>
    %91 = vector.shape_cast %90 : vector<1x128x128xf32> to vector<128x128xf32>
    %cst_63 = arith.constant dense<0.000000e+00> : vector<16x128xf32>
    %92 = tpu.matmul %88, %91, %cst_63 {dimension_numbers = #tpu.dot_dimension_numbers<[1], [0], [0], [1], [0, 0, 1, 1], [], []>} : vector<16x128xf32>, vector<128x128xf32>, vector<16x128xf32> -> vector<16x128xf32>
    %c1_64 = arith.constant 1 : index
    %c0_65 = arith.constant 0 : index
    %c0_66 = arith.constant 0 : index
    %93 = vector.load %arg3[%c1_64, %c0_65, %c0_66] : memref<3x128x128xf32, #tpu.memory_space<vmem>>, vector<1x128x128xf32>
    %94 = vector.shape_cast %93 : vector<1x128x128xf32> to vector<128x128xf32>
    %cst_67 = arith.constant dense<0.000000e+00> : vector<16x128xf32>
    %95 = tpu.matmul %88, %94, %cst_67 {dimension_numbers = #tpu.dot_dimension_numbers<[1], [0], [0], [1], [0, 0, 1, 1], [], []>} : vector<16x128xf32>, vector<128x128xf32>, vector<16x128xf32> -> vector<16x128xf32>
    %c2_68 = arith.constant 2 : index
    %c0_69 = arith.constant 0 : index
    %c0_70 = arith.constant 0 : index
    %96 = vector.load %arg3[%c2_68, %c0_69, %c0_70] : memref<3x128x128xf32, #tpu.memory_space<vmem>>, vector<1x128x128xf32>
    %97 = vector.shape_cast %96 : vector<1x128x128xf32> to vector<128x128xf32>
    %cst_71 = arith.constant dense<0.000000e+00> : vector<16x128xf32>
    %98 = tpu.matmul %88, %97, %cst_71 {dimension_numbers = #tpu.dot_dimension_numbers<[1], [0], [0], [1], [0, 0, 1, 1], [], []>} : vector<16x128xf32>, vector<128x128xf32>, vector<16x128xf32> -> vector<16x128xf32>
    %cst_72 = arith.constant dense<0.000000e+00> : vector<16x128xf32>
    %99 = tpu.matmul %9, %92, %cst_72 {dimension_numbers = #tpu.dot_dimension_numbers<[1], [0], [0], [1], [0, 0, 1, 1], [], []>} : vector<16x16xf32>, vector<16x128xf32>, vector<16x128xf32> -> vector<16x128xf32>
    %100 = arith.addf %99, %95 : vector<16x128xf32>
    %cst_73 = arith.constant dense<0.000000e+00> : vector<16x128xf32>
    %101 = tpu.matmul %14, %98, %cst_73 {dimension_numbers = #tpu.dot_dimension_numbers<[1], [0], [0], [1], [0, 0, 1, 1], [], []>} : vector<16x16xf32>, vector<16x128xf32>, vector<16x128xf32> -> vector<16x128xf32>
    %102 = arith.addf %100, %101 : vector<16x128xf32>
    %103 = vector.broadcast %89 : vector<1x128xf32> to vector<16x128xf32>
    %104 = arith.addf %102, %103 : vector<16x128xf32>
    %cst_74 = arith.constant 0.000000e+00 : f32
    %105 = vector.broadcast %cst_74 : f32 to vector<16x128xf32>
    %106 = arith.maximumf %104, %105 : vector<16x128xf32>
    %c0_75 = arith.constant 0 : index
    %c0_76 = arith.constant 0 : index
    %107 = vector.load %arg4[%c0_75, %c0_76] : memref<128x128xf32, #tpu.memory_space<vmem>>, vector<128x128xf32>
    %cst_77 = arith.constant dense<0.000000e+00> : vector<16x128xf32>
    %108 = tpu.matmul %106, %107, %cst_77 {dimension_numbers = #tpu.dot_dimension_numbers<[1], [0], [0], [1], [0, 0, 1, 1], [], []>} : vector<16x128xf32>, vector<128x128xf32>, vector<16x128xf32> -> vector<16x128xf32>
    %109 = vector.extract_strided_slice %2 {offsets = [2, 0], sizes = [1, 128], strides = [1, 1]} : vector<8x128xf32> to vector<1x128xf32>
    %110 = vector.broadcast %109 : vector<1x128xf32> to vector<16x128xf32>
    %111 = arith.addf %108, %110 : vector<16x128xf32>
    %112 = arith.addf %111, %70 : vector<16x128xf32>
    %cst_78 = arith.constant 0.000000e+00 : f32
    %113 = vector.broadcast %cst_78 : f32 to vector<16x128xf32>
    %114 = arith.maximumf %112, %113 : vector<16x128xf32>
    %c0_79 = arith.constant 0 : index
    %c0_80 = arith.constant 0 : index
    %c0_81 = arith.constant 0 : index
    %115 = vector.load %arg6[%c0_79, %c0_80, %c0_81] : memref<3x128x128xf32, #tpu.memory_space<vmem>>, vector<1x128x128xf32>
    %116 = vector.shape_cast %115 : vector<1x128x128xf32> to vector<128x128xf32>
    %cst_82 = arith.constant dense<0.000000e+00> : vector<16x128xf32>
    %117 = tpu.matmul %1, %116, %cst_82 {dimension_numbers = #tpu.dot_dimension_numbers<[1], [0], [0], [1], [0, 0, 1, 1], [], []>} : vector<16x128xf32>, vector<128x128xf32>, vector<16x128xf32> -> vector<16x128xf32>
    %c1_83 = arith.constant 1 : index
    %c0_84 = arith.constant 0 : index
    %c0_85 = arith.constant 0 : index
    %118 = vector.load %arg6[%c1_83, %c0_84, %c0_85] : memref<3x128x128xf32, #tpu.memory_space<vmem>>, vector<1x128x128xf32>
    %119 = vector.shape_cast %118 : vector<1x128x128xf32> to vector<128x128xf32>
    %cst_86 = arith.constant dense<0.000000e+00> : vector<16x128xf32>
    %120 = tpu.matmul %58, %119, %cst_86 {dimension_numbers = #tpu.dot_dimension_numbers<[1], [0], [0], [1], [0, 0, 1, 1], [], []>} : vector<16x128xf32>, vector<128x128xf32>, vector<16x128xf32> -> vector<16x128xf32>
    %121 = arith.addf %117, %120 : vector<16x128xf32>
    %c2_87 = arith.constant 2 : index
    %c0_88 = arith.constant 0 : index
    %c0_89 = arith.constant 0 : index
    %122 = vector.load %arg6[%c2_87, %c0_88, %c0_89] : memref<3x128x128xf32, #tpu.memory_space<vmem>>, vector<1x128x128xf32>
    %123 = vector.shape_cast %122 : vector<1x128x128xf32> to vector<128x128xf32>
    %cst_90 = arith.constant dense<0.000000e+00> : vector<16x128xf32>
    %124 = tpu.matmul %114, %123, %cst_90 {dimension_numbers = #tpu.dot_dimension_numbers<[1], [0], [0], [1], [0, 0, 1, 1], [], []>} : vector<16x128xf32>, vector<128x128xf32>, vector<16x128xf32> -> vector<16x128xf32>
    %125 = arith.addf %121, %124 : vector<16x128xf32>
    %126 = vector.extract_strided_slice %2 {offsets = [4, 0], sizes = [1, 128], strides = [1, 1]} : vector<8x128xf32> to vector<1x128xf32>
    %127 = vector.broadcast %126 : vector<1x128xf32> to vector<16x128xf32>
    %128 = arith.addf %125, %127 : vector<16x128xf32>
    %cst_91 = arith.constant 0.000000e+00 : f32
    %129 = vector.broadcast %cst_91 : f32 to vector<16x128xf32>
    %130 = arith.maximumf %128, %129 : vector<16x128xf32>
    %131 = vector.extract_strided_slice %2 {offsets = [0, 0], sizes = [1, 128], strides = [1, 1]} : vector<8x128xf32> to vector<1x128xf32>
    %c0_92 = arith.constant 0 : index
    %c0_93 = arith.constant 0 : index
    %c0_94 = arith.constant 0 : index
    %132 = vector.load %arg2[%c0_92, %c0_93, %c0_94] : memref<3x128x128xf32, #tpu.memory_space<vmem>>, vector<1x128x128xf32>
    %133 = vector.shape_cast %132 : vector<1x128x128xf32> to vector<128x128xf32>
    %cst_95 = arith.constant dense<0.000000e+00> : vector<16x128xf32>
    %134 = tpu.matmul %130, %133, %cst_95 {dimension_numbers = #tpu.dot_dimension_numbers<[1], [0], [0], [1], [0, 0, 1, 1], [], []>} : vector<16x128xf32>, vector<128x128xf32>, vector<16x128xf32> -> vector<16x128xf32>
    %c1_96 = arith.constant 1 : index
    %c0_97 = arith.constant 0 : index
    %c0_98 = arith.constant 0 : index
    %135 = vector.load %arg2[%c1_96, %c0_97, %c0_98] : memref<3x128x128xf32, #tpu.memory_space<vmem>>, vector<1x128x128xf32>
    %136 = vector.shape_cast %135 : vector<1x128x128xf32> to vector<128x128xf32>
    %cst_99 = arith.constant dense<0.000000e+00> : vector<16x128xf32>
    %137 = tpu.matmul %130, %136, %cst_99 {dimension_numbers = #tpu.dot_dimension_numbers<[1], [0], [0], [1], [0, 0, 1, 1], [], []>} : vector<16x128xf32>, vector<128x128xf32>, vector<16x128xf32> -> vector<16x128xf32>
    %c2_100 = arith.constant 2 : index
    %c0_101 = arith.constant 0 : index
    %c0_102 = arith.constant 0 : index
    %138 = vector.load %arg2[%c2_100, %c0_101, %c0_102] : memref<3x128x128xf32, #tpu.memory_space<vmem>>, vector<1x128x128xf32>
    %139 = vector.shape_cast %138 : vector<1x128x128xf32> to vector<128x128xf32>
    %cst_103 = arith.constant dense<0.000000e+00> : vector<16x128xf32>
    %140 = tpu.matmul %130, %139, %cst_103 {dimension_numbers = #tpu.dot_dimension_numbers<[1], [0], [0], [1], [0, 0, 1, 1], [], []>} : vector<16x128xf32>, vector<128x128xf32>, vector<16x128xf32> -> vector<16x128xf32>
    %cst_104 = arith.constant dense<0.000000e+00> : vector<16x128xf32>
    %141 = tpu.matmul %9, %134, %cst_104 {dimension_numbers = #tpu.dot_dimension_numbers<[1], [0], [0], [1], [0, 0, 1, 1], [], []>} : vector<16x16xf32>, vector<16x128xf32>, vector<16x128xf32> -> vector<16x128xf32>
    %142 = arith.addf %141, %137 : vector<16x128xf32>
    %cst_105 = arith.constant dense<0.000000e+00> : vector<16x128xf32>
    %143 = tpu.matmul %14, %140, %cst_105 {dimension_numbers = #tpu.dot_dimension_numbers<[1], [0], [0], [1], [0, 0, 1, 1], [], []>} : vector<16x16xf32>, vector<16x128xf32>, vector<16x128xf32> -> vector<16x128xf32>
    %144 = arith.addf %142, %143 : vector<16x128xf32>
    %145 = vector.broadcast %131 : vector<1x128xf32> to vector<16x128xf32>
    %146 = arith.addf %144, %145 : vector<16x128xf32>
    %cst_106 = arith.constant 0.000000e+00 : f32
    %147 = vector.broadcast %cst_106 : f32 to vector<16x128xf32>
    %148 = arith.maximumf %146, %147 : vector<16x128xf32>
    %149 = vector.extract_strided_slice %2 {offsets = [1, 0], sizes = [1, 128], strides = [1, 1]} : vector<8x128xf32> to vector<1x128xf32>
    %c0_107 = arith.constant 0 : index
    %c0_108 = arith.constant 0 : index
    %c0_109 = arith.constant 0 : index
    %150 = vector.load %arg3[%c0_107, %c0_108, %c0_109] : memref<3x128x128xf32, #tpu.memory_space<vmem>>, vector<1x128x128xf32>
    %151 = vector.shape_cast %150 : vector<1x128x128xf32> to vector<128x128xf32>
    %cst_110 = arith.constant dense<0.000000e+00> : vector<16x128xf32>
    %152 = tpu.matmul %148, %151, %cst_110 {dimension_numbers = #tpu.dot_dimension_numbers<[1], [0], [0], [1], [0, 0, 1, 1], [], []>} : vector<16x128xf32>, vector<128x128xf32>, vector<16x128xf32> -> vector<16x128xf32>
    %c1_111 = arith.constant 1 : index
    %c0_112 = arith.constant 0 : index
    %c0_113 = arith.constant 0 : index
    %153 = vector.load %arg3[%c1_111, %c0_112, %c0_113] : memref<3x128x128xf32, #tpu.memory_space<vmem>>, vector<1x128x128xf32>
    %154 = vector.shape_cast %153 : vector<1x128x128xf32> to vector<128x128xf32>
    %cst_114 = arith.constant dense<0.000000e+00> : vector<16x128xf32>
    %155 = tpu.matmul %148, %154, %cst_114 {dimension_numbers = #tpu.dot_dimension_numbers<[1], [0], [0], [1], [0, 0, 1, 1], [], []>} : vector<16x128xf32>, vector<128x128xf32>, vector<16x128xf32> -> vector<16x128xf32>
    %c2_115 = arith.constant 2 : index
    %c0_116 = arith.constant 0 : index
    %c0_117 = arith.constant 0 : index
    %156 = vector.load %arg3[%c2_115, %c0_116, %c0_117] : memref<3x128x128xf32, #tpu.memory_space<vmem>>, vector<1x128x128xf32>
    %157 = vector.shape_cast %156 : vector<1x128x128xf32> to vector<128x128xf32>
    %cst_118 = arith.constant dense<0.000000e+00> : vector<16x128xf32>
    %158 = tpu.matmul %148, %157, %cst_118 {dimension_numbers = #tpu.dot_dimension_numbers<[1], [0], [0], [1], [0, 0, 1, 1], [], []>} : vector<16x128xf32>, vector<128x128xf32>, vector<16x128xf32> -> vector<16x128xf32>
    %cst_119 = arith.constant dense<0.000000e+00> : vector<16x128xf32>
    %159 = tpu.matmul %9, %152, %cst_119 {dimension_numbers = #tpu.dot_dimension_numbers<[1], [0], [0], [1], [0, 0, 1, 1], [], []>} : vector<16x16xf32>, vector<16x128xf32>, vector<16x128xf32> -> vector<16x128xf32>
    %160 = arith.addf %159, %155 : vector<16x128xf32>
    %cst_120 = arith.constant dense<0.000000e+00> : vector<16x128xf32>
    %161 = tpu.matmul %14, %158, %cst_120 {dimension_numbers = #tpu.dot_dimension_numbers<[1], [0], [0], [1], [0, 0, 1, 1], [], []>} : vector<16x16xf32>, vector<16x128xf32>, vector<16x128xf32> -> vector<16x128xf32>
    %162 = arith.addf %160, %161 : vector<16x128xf32>
    %163 = vector.broadcast %149 : vector<1x128xf32> to vector<16x128xf32>
    %164 = arith.addf %162, %163 : vector<16x128xf32>
    %cst_121 = arith.constant 0.000000e+00 : f32
    %165 = vector.broadcast %cst_121 : f32 to vector<16x128xf32>
    %166 = arith.maximumf %164, %165 : vector<16x128xf32>
    %c0_122 = arith.constant 0 : index
    %c0_123 = arith.constant 0 : index
    %167 = vector.load %arg4[%c0_122, %c0_123] : memref<128x128xf32, #tpu.memory_space<vmem>>, vector<128x128xf32>
    %cst_124 = arith.constant dense<0.000000e+00> : vector<16x128xf32>
    %168 = tpu.matmul %166, %167, %cst_124 {dimension_numbers = #tpu.dot_dimension_numbers<[1], [0], [0], [1], [0, 0, 1, 1], [], []>} : vector<16x128xf32>, vector<128x128xf32>, vector<16x128xf32> -> vector<16x128xf32>
    %169 = vector.extract_strided_slice %2 {offsets = [2, 0], sizes = [1, 128], strides = [1, 1]} : vector<8x128xf32> to vector<1x128xf32>
    %170 = vector.broadcast %169 : vector<1x128xf32> to vector<16x128xf32>
    %171 = arith.addf %168, %170 : vector<16x128xf32>
    %172 = arith.addf %171, %130 : vector<16x128xf32>
    %cst_125 = arith.constant 0.000000e+00 : f32
    %173 = vector.broadcast %cst_125 : f32 to vector<16x128xf32>
    %174 = arith.maximumf %172, %173 : vector<16x128xf32>
    %c0_126 = arith.constant 0 : index
    %c0_127 = arith.constant 0 : index
    %c0_128 = arith.constant 0 : index
    %175 = vector.load %arg7[%c0_126, %c0_127, %c0_128] : memref<4x128x128xf32, #tpu.memory_space<vmem>>, vector<1x128x128xf32>
    %176 = vector.shape_cast %175 : vector<1x128x128xf32> to vector<128x128xf32>
    %cst_129 = arith.constant dense<0.000000e+00> : vector<16x128xf32>
    %177 = tpu.matmul %1, %176, %cst_129 {dimension_numbers = #tpu.dot_dimension_numbers<[1], [0], [0], [1], [0, 0, 1, 1], [], []>} : vector<16x128xf32>, vector<128x128xf32>, vector<16x128xf32> -> vector<16x128xf32>
    %c1_130 = arith.constant 1 : index
    %c0_131 = arith.constant 0 : index
    %c0_132 = arith.constant 0 : index
    %178 = vector.load %arg7[%c1_130, %c0_131, %c0_132] : memref<4x128x128xf32, #tpu.memory_space<vmem>>, vector<1x128x128xf32>
    %179 = vector.shape_cast %178 : vector<1x128x128xf32> to vector<128x128xf32>
    %cst_133 = arith.constant dense<0.000000e+00> : vector<16x128xf32>
    %180 = tpu.matmul %58, %179, %cst_133 {dimension_numbers = #tpu.dot_dimension_numbers<[1], [0], [0], [1], [0, 0, 1, 1], [], []>} : vector<16x128xf32>, vector<128x128xf32>, vector<16x128xf32> -> vector<16x128xf32>
    %181 = arith.addf %177, %180 : vector<16x128xf32>
    %c2_134 = arith.constant 2 : index
    %c0_135 = arith.constant 0 : index
    %c0_136 = arith.constant 0 : index
    %182 = vector.load %arg7[%c2_134, %c0_135, %c0_136] : memref<4x128x128xf32, #tpu.memory_space<vmem>>, vector<1x128x128xf32>
    %183 = vector.shape_cast %182 : vector<1x128x128xf32> to vector<128x128xf32>
    %cst_137 = arith.constant dense<0.000000e+00> : vector<16x128xf32>
    %184 = tpu.matmul %114, %183, %cst_137 {dimension_numbers = #tpu.dot_dimension_numbers<[1], [0], [0], [1], [0, 0, 1, 1], [], []>} : vector<16x128xf32>, vector<128x128xf32>, vector<16x128xf32> -> vector<16x128xf32>
    %185 = arith.addf %181, %184 : vector<16x128xf32>
    %c3 = arith.constant 3 : index
    %c0_138 = arith.constant 0 : index
    %c0_139 = arith.constant 0 : index
    %186 = vector.load %arg7[%c3, %c0_138, %c0_139] : memref<4x128x128xf32, #tpu.memory_space<vmem>>, vector<1x128x128xf32>
    %187 = vector.shape_cast %186 : vector<1x128x128xf32> to vector<128x128xf32>
    %cst_140 = arith.constant dense<0.000000e+00> : vector<16x128xf32>
    %188 = tpu.matmul %174, %187, %cst_140 {dimension_numbers = #tpu.dot_dimension_numbers<[1], [0], [0], [1], [0, 0, 1, 1], [], []>} : vector<16x128xf32>, vector<128x128xf32>, vector<16x128xf32> -> vector<16x128xf32>
    %189 = arith.addf %185, %188 : vector<16x128xf32>
    %190 = vector.extract_strided_slice %2 {offsets = [5, 0], sizes = [1, 128], strides = [1, 1]} : vector<8x128xf32> to vector<1x128xf32>
    %191 = vector.broadcast %190 : vector<1x128xf32> to vector<16x128xf32>
    %192 = arith.addf %189, %191 : vector<16x128xf32>
    %cst_141 = arith.constant 0.000000e+00 : f32
    %193 = vector.broadcast %cst_141 : f32 to vector<16x128xf32>
    %194 = arith.maximumf %192, %193 : vector<16x128xf32>
    %195 = vector.shape_cast %194 : vector<16x128xf32> to vector<1x16x128xf32>
    %c0_142 = arith.constant 0 : index
    %c0_143 = arith.constant 0 : index
    %c0_144 = arith.constant 0 : index
    %196 = vector.load %arg9[%c0_142, %c0_143, %c0_144] : memref<1x16x128xf32, #tpu.memory_space<vmem>>, vector<1x16x128xf32>
    tpu.vector_store %arg9[%c0_142, %c0_143, %c0_144], %195 {strides = array<i32>} : memref<1x16x128xf32, #tpu.memory_space<vmem>>, vector<1x16x128xf32>,
    return
  }
  func.func @transform_0(%arg0: i32) -> (i32, i32, i32) {
    %c0_i32 = arith.constant 0 : i32
    %c0_i32_0 = arith.constant 0 : i32
    %c0_i32_1 = arith.constant 0 : i32
    return %arg0, %c0_i32, %c0_i32_0 : i32, i32, i32
  }
  func.func @transform_1(%arg0: i32) -> (i32, i32, i32) {
    %c0_i32 = arith.constant 0 : i32
    %c0_i32_0 = arith.constant 0 : i32
    %c0_i32_1 = arith.constant 0 : i32
    %c0_i32_2 = arith.constant 0 : i32
    return %c0_i32, %c0_i32_0, %c0_i32_1 : i32, i32, i32
  }
  func.func @transform_2(%arg0: i32) -> (i32, i32, i32) {
    %c0_i32 = arith.constant 0 : i32
    %c0_i32_0 = arith.constant 0 : i32
    %c0_i32_1 = arith.constant 0 : i32
    %c0_i32_2 = arith.constant 0 : i32
    return %c0_i32, %c0_i32_0, %c0_i32_1 : i32, i32, i32
  }
  func.func @transform_3(%arg0: i32) -> (i32, i32) {
    %c0_i32 = arith.constant 0 : i32
    %c0_i32_0 = arith.constant 0 : i32
    %c0_i32_1 = arith.constant 0 : i32
    return %c0_i32, %c0_i32_0 : i32, i32
  }
  func.func @transform_4(%arg0: i32) -> (i32, i32, i32) {
    %c0_i32 = arith.constant 0 : i32
    %c0_i32_0 = arith.constant 0 : i32
    %c0_i32_1 = arith.constant 0 : i32
    %c0_i32_2 = arith.constant 0 : i32
    return %c0_i32, %c0_i32_0, %c0_i32_1 : i32, i32, i32
  }
  func.func @transform_5(%arg0: i32) -> (i32, i32, i32) {
    %c0_i32 = arith.constant 0 : i32
    %c0_i32_0 = arith.constant 0 : i32
    %c0_i32_1 = arith.constant 0 : i32
    %c0_i32_2 = arith.constant 0 : i32
    return %c0_i32, %c0_i32_0, %c0_i32_1 : i32, i32, i32
  }
  func.func @transform_6(%arg0: i32) -> (i32, i32, i32) {
    %c0_i32 = arith.constant 0 : i32
    %c0_i32_0 = arith.constant 0 : i32
    %c0_i32_1 = arith.constant 0 : i32
    %c0_i32_2 = arith.constant 0 : i32
    return %c0_i32, %c0_i32_0, %c0_i32_1 : i32, i32, i32
  }
  func.func @transform_7(%arg0: i32) -> (i32, i32) {
    %c0_i32 = arith.constant 0 : i32
    %c0_i32_0 = arith.constant 0 : i32
    %c0_i32_1 = arith.constant 0 : i32
    return %c0_i32, %c0_i32_0 : i32, i32
  }
  func.func @transform_8(%arg0: i32) -> (i32, i32, i32) {
    %c0_i32 = arith.constant 0 : i32
    %c0_i32_0 = arith.constant 0 : i32
    %c0_i32_1 = arith.constant 0 : i32
    return %arg0, %c0_i32, %c0_i32_0 : i32, i32, i32
  }
}

</mosaic_0001>

<bundles_post_ra>
// kernel: tile.33
= control target key start
LH: loop header
LB: loop body
LE: loop exit
PB: predicated region body
PF: predicated region fallthrough
CT: control target
= control target key end

     0   :  { %s28_s0 = inlined_call_operand.vmem [shape: f32[8], index: 0, kind: input, shape index: {}]   ;;  %s29_s1 = inlined_call_operand.vmem [shape: f32[16,8], index: 1, kind: output, shape index: {}]  }
   0x1   :  { %v4_v0 = vld [vmem:[%s28_s0] ss:$0 sm:$0xff] }
   0x2   :  { %5 = vst [vmem:[%s29_s1] sm:$0xff] %v4_v0 }
   0x3   :  { %8 = vst [vmem:[%s29_s1 + $0x8] sm:$0xff] %v4_v0 }

// kernel: tile.54
= control target key start
LH: loop header
LB: loop body
LE: loop exit
PB: predicated region body
PF: predicated region fallthrough
CT: control target
= control target key end

     0   :  { %s131_s10 = smov 120   ;;  %s132_s11 = smov 104   ;;  %vm3_vm0 = vcmask 64512   ;;  %vm9_vm1 = vcmask 1048512   ;;  %vm15_vm2 = vcmask 982912   ;;  %vm21_vm3 = vcmask 917312   ;;  %s207_s0 = inlined_call_operand.vmem [shape: f32[16,8], index: 0, kind: input, shape index: {}]   ;;  %s208_s1 = inlined_call_operand.vmem [shape: f32[1,128], index: 1, kind: output, shape index: {}]  }
   0x1   :  { %v101_v0 = vld [vmem:[%s207_s0 + $0xf] sm:$0x1]   ;;  %v103_v1 = vld [vmem:[%s207_s0 + $0xd] sm:$0x1]   ;;  %v105_v2 = vld [vmem:[%s207_s0 + $0xb] sm:$0x1]  }
   0x2   :  { %7 = vrot.lane.b32.xlu0 %v101_v0, %s131_s10  ;;  %19 = vrot.lane.b32.xlu1 %v103_v1, %s132_s11  ;;  %s133_s14 = smov 88   ;;  %v102_v3 = vld [vmem:[%s207_s0 + $0xe] sm:$0x1]   ;;  %v104_v4 = vld [vmem:[%s207_s0 + $0xc] sm:$0x1]   ;;  %s134_s19 = smov 112  }
   0x3   :  { %31 = vrot.lane.b32.xlu2 %v105_v2, %s133_s14  ;;  %s135_s20 = smov 96   ;;  %v106_v5 = vld [vmem:[%s207_s0 + $0xa] sm:$0x1]   ;;  %s136_s23 = smov 80   ;;  %v107_v6 = vld [vmem:[%s207_s0 + $0x9] sm:$0x1]  }
   0x4   :  { %v108_v7 = vld [vmem:[%s207_s0 + $0x8] sm:$0x1]   ;;  %s137_s28 = smov 72   ;;  %s138_s29 = smov 64   ;;  %v109_v8 = vld [vmem:[%s207_s0 + $0x7] sm:$0x1]  }
   0x5   :  { %s139_s3 = smov 56   ;;  %v110_v9 = vld [vmem:[%s207_s0 + $0x6] sm:$0x1]   ;;  %v111_v10 = vld [vmem:[%s207_s0 + $0x5] sm:$0x1]   ;;  %s140_s8 = smov 48  }
   0x6   :  { %s141_s9 = smov 40   ;;  %v112_v11 = vld [vmem:[%s207_s0 + $0x4] sm:$0x1]   ;;  %s142_s12 = smov 32   ;;  %v113_v12 = vld [vmem:[%s207_s0 + $0x3] sm:$0x1]  }
   0x7   :  { %v114_v13 = vld [vmem:[%s207_s0 + $0x2] sm:$0x1]   ;;  %s143_s17 = smov 24   ;;  %s144_s18 = smov 16   ;;  %v115_v14 = vld [vmem:[%s207_s0 + $0x1] sm:$0x1]  }
   0x8   :  { %s145_s21 = smov 8   ;;  %v2_v15 = vld [vmem:[%s207_s0] sm:$0x1]   ;;  %vm27_vm4 = vcmask 851712   ;;  %vm33_vm5 = vcmask 786112   ;;  %vm39_vm6 = vcmask 720512  }
   0x9   :  { %4 = vst.msk [vmem:[#allocation0] sm:$0x1] %vm3_vm0, %v2_v15   ;;  %vm45_vm7 = vcmask 654912   ;;  %vm51_vm8 = vcmask 589312   ;;  %vm57_vm9 = vcmask 523712   ;;  %vm63_vm10 = vcmask 458112  }
   0xa   :  { %13 = vrot.lane.b32.xlu0 %v102_v3, %s134_s19  ;;  %25 = vrot.lane.b32.xlu1 %v104_v4, %s135_s20  ;;  %vm69_vm11 = vcmask 392512   ;;  %vm75_vm12 = vcmask 326912   ;;  %vm81_vm13 = vcmask 261312   ;;  %vm87_vm14 = vcmask 195712  }
   0xb   :  { %37 = vrot.lane.b32.xlu2 %v106_v5, %s136_s23  ;;  %vm93_vm15 = vcmask 130112  }
  0x12   :  { %43 = vrot.lane.b32.xlu0 %v107_v6, %s137_s28  ;;  %49 = vrot.lane.b32.xlu1 %v108_v7, %s138_s29 }
  0x13   :  { %55 = vrot.lane.b32.xlu2 %v109_v8, %s139_s3 }
  0x1a   :  { %61 = vrot.lane.b32.xlu0 %v110_v9, %s140_s8  ;;  %67 = vrot.lane.b32.xlu1 %v111_v10, %s141_s9 }
  0x1b   :  { %73 = vrot.lane.b32.xlu2 %v112_v11, %s142_s12 }
  0x22   :  { %79 = vrot.lane.b32.xlu0 %v113_v12, %s143_s17  ;;  %85 = vrot.lane.b32.xlu1 %v114_v13, %s144_s18 }
  0x23   :  { %91 = vrot.lane.b32.xlu2 %v115_v14, %s145_s21 }
  0x5d   :  { %v32_v16 = vpop.permute.xlu2 %31  }
  0x65   :  { %v38_v17 = vpop.permute.xlu2 %37  }
  0x6d   :  { %v56_v18 = vpop.permute.xlu2 %55  }
  0x74   :  { %v8_v19 = vpop.permute.xlu0 %7   ;;  %v20_v20 = vpop.permute.xlu1 %19  }
  0x75   :  { %10 = vst.msk [vmem:[#allocation0] sm:$0x1] %vm9_vm1, %v8_v19   ;;  %v74_v21 = vpop.permute.xlu2 %73  }
  0x7c   :  { %v14_v22 = vpop.permute.xlu0 %13   ;;  %v26_v23 = vpop.permute.xlu1 %25  }
  0x7d   :  { %16 = vst.msk [vmem:[#allocation0] sm:$0x1] %vm15_vm2, %v14_v22   ;;  %v92_v24 = vpop.permute.xlu2 %91  }
  0x7e   :  { %22 = vst.msk [vmem:[#allocation0] sm:$0x1] %vm21_vm3, %v20_v20  }
  0x7f   :  { %28 = vst.msk [vmem:[#allocation0] sm:$0x1] %vm27_vm4, %v26_v23  }
  0x80   :  { %34 = vst.msk [vmem:[#allocation0] sm:$0x1] %vm33_vm5, %v32_v16  }
  0x81   :  { %40 = vst.msk [vmem:[#allocation0] sm:$0x1] %vm39_vm6, %v38_v17  }
  0x84   :  { %v44_v25 = vpop.permute.xlu0 %43   ;;  %v50_v26 = vpop.permute.xlu1 %49  }
  0x85   :  { %46 = vst.msk [vmem:[#allocation0] sm:$0x1] %vm45_vm7, %v44_v25  }
  0x86   :  { %52 = vst.msk [vmem:[#allocation0] sm:$0x1] %vm51_vm8, %v50_v26  }
  0x87   :  { %58 = vst.msk [vmem:[#allocation0] sm:$0x1] %vm57_vm9, %v56_v18  }
  0x8c   :  { %v62_v27 = vpop.permute.xlu0 %61   ;;  %v68_v28 = vpop.permute.xlu1 %67  }
  0x8d   :  { %64 = vst.msk [vmem:[#allocation0] sm:$0x1] %vm63_vm10, %v62_v27  }
  0x8e   :  { %70 = vst.msk [vmem:[#allocation0] sm:$0x1] %vm69_vm11, %v68_v28  }
  0x8f   :  { %76 = vst.msk [vmem:[#allocation0] sm:$0x1] %vm75_vm12, %v74_v21  }
  0x94   :  { %v80_v29 = vpop.permute.xlu0 %79   ;;  %v86_v30 = vpop.permute.xlu1 %85  }
  0x95   :  { %82 = vst.msk [vmem:[#allocation0] sm:$0x1] %vm81_vm13, %v80_v29  }
  0x96   :  { %88 = vst.msk [vmem:[#allocation0] sm:$0x1] %vm87_vm14, %v86_v30  }
  0x97   :  { %94 = vst.msk [vmem:[#allocation0] sm:$0x1] %vm93_vm15, %v92_v24  }
  0x9e   :  { %v97_v31 = vld [vmem:[#allocation0] sm:$0x1] }
  0x9f   :  { %100 = vst [vmem:[%s208_s1] sm:$0x1] %v97_v31 }

// kernel: block_forward.1
= control target key start
LH: loop header
LB: loop body
LE: loop exit
PB: predicated region body
PF: predicated region fallthrough
CT: control target
= control target key end

     0   :  { %s2063_s27 = smov 0   ;;  %s3771_s0 = inlined_call_operand.vmem [shape: f32[2,16,128], index: 0, kind: input, shape index: {}]   ;;  %s3772_s1 = inlined_call_operand.vmem [shape: f32[3,128,128], index: 1, kind: input, shape index: {}]   ;;  %s3773_s2 = inlined_call_operand.vmem [shape: f32[3,128,128], index: 2, kind: input, shape index: {}]   ;;  %s3774_s3 = inlined_call_operand.vmem [shape: f32[128,128], index: 3, kind: input, shape index: {}]   ;;  %s3775_s4 = inlined_call_operand.vmem [shape: f32[2,128,128], index: 4, kind: input, shape index: {}]   ;;  %s3776_s5 = inlined_call_operand.vmem [shape: f32[3,128,128], index: 5, kind: input, shape index: {}]   ;;  %s3777_s6 = inlined_call_operand.vmem [shape: f32[4,128,128], index: 6, kind: input, shape index: {}]   ;;  %s3778_s7 = inlined_call_operand.vmem [shape: f32[8,128], index: 7, kind: input, shape index: {}]   ;;  %s3779_s8 = inlined_call_operand.vmem [shape: f32[2,16,128], index: 8, kind: output, shape index: {}]  }
   0x1 LB: > { %s1704_s28 = sadd.s32 4294967295, %s2015_s27   ;;  %p1708_p0 = scmp.ge.s32.totalorder %s2015_s27, 1  ;;  %s2015_s27 = sphi %s2063_s27, %s18_s27  }
   0x2   : > { %p262_p1 = scmp.lt.s32.totalorder %s2015_s27, 3 }
   0x4   : > { %p263_p2 = pnand %p1708_p0, %p262_p1 }
   0x6   : > { %266 = sbr.rel (%p263_p2) target bundleno = 2592 (0xa20), region = 52 }
   0xb   : > { %v2074_v0 = vld [vmem:[%s3772_s1 + $0x78] sm:$0xff]  ;;  %v2084_v2 = vld [vmem:[%s3772_s1 + $0x70] sm:$0xff]  ;;  %v2096_v4 = vld [vmem:[%s3772_s1 + $0x68] sm:$0xff]  ;;  %p296_p3 = scmp.lt.s32.totalorder %s1704_s28, 1  ;;  %v309_v50 = vlaneseq  ;;  %vm449_vm1 = vcmask 130048  }
   0xc   : > { %v2079_v1 = vld [vmem:[%s3772_s1 + $0x178] sm:$0xff]  ;;  %346 = vmatpush.msra.mxu0 %v2074_v0  ;;  %v2091_v3 = vld [vmem:[%s3772_s1 + $0x170] sm:$0xff]  ;;  %v2101_v5 = vld [vmem:[%s3772_s1 + $0x168] sm:$0xff] }
   0xd   : > { %3850 = vst [vmem:[#allocation2_spill] sm:$0xff] %v2079_v1  ;;  %426 = vmatpush.msra.mxu2 %v2079_v1  ;;  %v2108_v6 = vld [vmem:[%s3772_s1 + $0x60] sm:$0xff]  ;;  %v2120_v8 = vld [vmem:[%s3772_s1 + $0x58] sm:$0xff]  ;;  %v2132_v10 = vld [vmem:[%s3772_s1 + $0x50] sm:$0xff]  ;;  %s3959_s28 = smov (!%p296_p3, %s1704_s28), 1  ;;  %v310_v51 = vshrl.u32 %v309_v50, 7 }
   0xe   : > { %3851 = vst [vmem:[#allocation3_spill] sm:$0xff] %v2091_v3  ;;  %347 = vmatpush.msra.mxu0 %v2084_v2  ;;  %v2113_v7 = vld [vmem:[%s3772_s1 + $0x160] sm:$0xff]  ;;  %v2125_v9 = vld [vmem:[%s3772_s1 + $0x158] sm:$0xff]  ;;  %v2137_v11 = vld [vmem:[%s3772_s1 + $0x150] sm:$0xff]  ;;  %s1905_s13 = sshll.u32 %s3959_s28, 4  ;;  %v313_v53 = vand.u32 127, %v309_v50 }
   0xf   : > { %3852 = vst [vmem:[#allocation4_spill] sm:$0xff] %v2101_v5  ;;  %427 = vmatpush.msra.mxu2 %v2091_v3  ;;  %v2144_v12 = vld [vmem:[%s3772_s1 + $0x48] sm:$0xff]  ;;  %v2156_v14 = vld [vmem:[%s3772_s1 + $0xf8] sm:$0xff]  ;;  %v2161_v15 = vld [vmem:[%s3772_s1 + $0xf0] sm:$0xff]  ;;  %s2301_s24 = scalar_lea.vmem %s3771_s0, %s1905_s13  ;;  %v1713_v54 = vadd.s32 4294967295, %v310_v51  ;;  %v311_v60 = vadd.s32 8, %v310_v51  ;;  %s305_s21 = scalar_lea.vmem %s3779_s8, %s1905_s13 }
  0x10   : > { %3853 = vst [vmem:[#allocation5_spill] sm:$0xff] %v2113_v7  ;;  %348 = vmatpush.msra.mxu0 %v2096_v4  ;;  %v2149_v13 = vld [vmem:[%s3772_s1 + $0x148] sm:$0xff]  ;;  %v2166_v16 = vld [vmem:[%s3772_s1 + $0x40] sm:$0xff]  ;;  %386 = vmatpush.msra.mxu1 %v2156_v14  ;;  %v2184_v19 = vld [vmem:[%s3772_s1 + $0x38] sm:$0xff] }
  0x11   : > { %428 = vmatpush.msra.mxu2 %v2101_v5  ;;  %3854 = vst [vmem:[#allocation6_spill] sm:$0xff] %v2125_v9  ;;  %v2171_v17 = vld [vmem:[%s3772_s1 + $0x140] sm:$0xff]  ;;  %v2179_v18 = vld [vmem:[%s3772_s1 + $0xe8] sm:$0xff]  ;;  %v2189_v20 = vld [vmem:[%s3772_s1 + $0x138] sm:$0xff]  ;;  %vm316_vm0 = vcmp.eq.s32.totalorder %v313_v53, %v1713_v54  ;;  %v2017_v54 = vmov 0.0  }
  0x12   : > { %349 = vmatpush.msra.mxu0 %v2108_v6  ;;  %3855 = vst [vmem:[#allocation7_spill] sm:$0xff] %v2137_v11  ;;  %387 = vmatpush.msra.mxu1 %v2161_v15  ;;  %v2199_v21 = vld [vmem:[%s3772_s1 + $0xe0] sm:$0xff]  ;;  %v2204_v22 = vld [vmem:[%s3772_s1 + $0x30] sm:$0xff]  ;;  %v2217_v24 = vld [vmem:[%s3772_s1 + $0xd8] sm:$0xff] }
  0x13   : > { %429 = vmatpush.msra.mxu2 %v2113_v7  ;;  %3856 = vst [vmem:[#allocation8_spill] sm:$0xff] %v2149_v13  ;;  %v2209_v23 = vld [vmem:[%s3772_s1 + $0x130] sm:$0xff]  ;;  %v2222_v25 = vld [vmem:[%s3772_s1 + $0x28] sm:$0xff]  ;;  %v2244_v28 = vld [vmem:[%s3772_s1 + $0x20] sm:$0xff] }
  0x14   : > { %350 = vmatpush.msra.mxu0 %v2120_v8  ;;  %3857 = vst [vmem:[#allocation9_spill] sm:$0xff] %v2171_v17  ;;  %388 = vmatpush.msra.mxu1 %v2179_v18  ;;  %v2227_v26 = vld [vmem:[%s3772_s1 + $0x128] sm:$0xff]  ;;  %v2239_v27 = vld [vmem:[%s3772_s1 + $0xd0] sm:$0xff]  ;;  %v2249_v29 = vld [vmem:[%s3772_s1 + $0x120] sm:$0xff] }
  0x15   : > { %430 = vmatpush.msra.mxu2 %v2125_v9  ;;  %3858 = vst [vmem:[#allocation10_spill] sm:$0xff] %v2189_v20  ;;  %v2257_v30 = vld [vmem:[%s3772_s1 + $0xc8] sm:$0xff]  ;;  %v2262_v31 = vld [vmem:[%s3772_s1 + $0x18] sm:$0xff]  ;;  %v2276_v33 = vld [vmem:[%s3772_s1 + $0x10] sm:$0xff] }
  0x16   : > { %351 = vmatpush.msra.mxu0 %v2132_v10  ;;  %3859 = vst [vmem:[#allocation11_spill] sm:$0xff] %v2209_v23  ;;  %389 = vmatpush.msra.mxu1 %v2199_v21  ;;  %v2267_v32 = vld [vmem:[%s3772_s1 + $0x118] sm:$0xff]  ;;  %v2281_v34 = vld [vmem:[%s3772_s1 + $0x110] sm:$0xff]  ;;  %v2289_v35 = vld [vmem:[%s3772_s1 + $0x8] sm:$0xff] }
  0x17   : > { %431 = vmatpush.msra.mxu2 %v2137_v11  ;;  %3860 = vst [vmem:[#allocation12_spill] sm:$0xff] %v2227_v26  ;;  %v2294_v36 = vld [vmem:[%s3772_s1 + $0x108] sm:$0xff]  ;;  %v2308_v37 = vld [vmem:[%s3772_s1] sm:$0xff]  ;;  %v2337_v42 = vld [vmem:[%s3772_s1 + $0xb8] sm:$0xff] }
  0x18   : > { %352 = vmatpush.msra.mxu0 %v2144_v12  ;;  %3861 = vst [vmem:[#allocation13_spill] sm:$0xff] %v2249_v29  ;;  %390 = vmatpush.msra.mxu1 %v2217_v24  ;;  %v2313_v38 = vld [vmem:[%s3772_s1 + $0x100] sm:$0xff]  ;;  %v2325_v40 = vld [vmem:[%s2301_s24 + $0x8] sm:$0xff]  ;;  %v2343_v43 = vld [vmem:[%s3772_s1 + $0xb0] sm:$0xff] }
  0x19   : > { %432 = vmatpush.msra.mxu2 %v2149_v13  ;;  %3862 = vst [vmem:[#allocation14_spill] sm:$0xff] %v2267_v32  ;;  %v2318_v39 = vld [vmem:[%s2301_s24] sm:$0xff]  ;;  %v2350_v44 = vld [vmem:[%s3772_s1 + $0xa8] sm:$0xff]  ;;  %v2362_v46 = vld [vmem:[%s3772_s1 + $0x98] sm:$0xff] }
  0x1a   : > { %353 = vmatpush.msra.mxu0 %v2166_v16  ;;  %391 = vmatpush.msra.mxu1 %v2239_v27  ;;  %3863 = vst [vmem:[#allocation15_spill] sm:$0xff] %v2281_v34  ;;  %v2332_v41 = vld [vmem:[%s3772_s1 + $0xc0] sm:$0xff]  ;;  %v2368_v47 = vld [vmem:[%s3772_s1 + $0x90] sm:$0xff]  ;;  %v2374_v48 = vld [vmem:[%s3772_s1 + $0x88] sm:$0xff] }
  0x1b   : > { %433 = vmatpush.msra.mxu2 %v2171_v17  ;;  %3864 = vst [vmem:[#allocation16_spill] sm:$0xff] %v2294_v36  ;;  %v2356_v45 = vld [vmem:[%s3772_s1 + $0xa0] sm:$0xff]  ;;  %v2388_v55 = vld [vmem:[%s3773_s2 + $0xf8] sm:$0xff]  ;;  %v2400_v57 = vld [vmem:[%s3773_s2 + $0xf0] sm:$0xff] }
  0x1c   : > { %354 = vmatpush.msra.mxu0 %v2184_v19  ;;  %392 = vmatpush.msra.mxu1 %v2257_v30  ;;  %3865 = vst [vmem:[#allocation17_spill] sm:$0xff] %v2313_v38  ;;  %v2380_v49 = vld [vmem:[%s3772_s1 + $0x80] sm:$0xff]  ;;  %v2393_v56 = vld [vmem:[%s3773_s2 + $0x178] sm:$0xff]  ;;  %v2405_v58 = vld [vmem:[%s3773_s2 + $0x170] sm:$0xff] }
  0x1d   : > { %434 = vmatpush.msra.mxu2 %v2189_v20  ;;  %3866 = vst [vmem:[#allocation18_spill] sm:$0xff] %v2318_v39  ;;  %v2410_v61 = vld [vmem:[%s3773_s2 + $0xe8] sm:$0xff]  ;;  %v2422_v50 = vld [vmem:[%s3773_s2 + $0xe0] sm:$0xff]  ;;  %v2548_v17 = vld [vmem:[%s3773_s2 + $0x38] sm:$0xff] }
  0x1e   : > { %355 = vmatpush.msra.mxu0 %v2204_v22  ;;  %3867 = vst [vmem:[#allocation19_spill] sm:$0xff] %v2325_v40  ;;  %393 = vmatpush.msra.mxu1 %v2332_v41  ;;  %v2417_v62 = vld [vmem:[%s3773_s2 + $0x168] sm:$0xff]  ;;  %v2539_v20 = vld [vmem:[%s3773_s2 + $0x140] sm:$0xff]  ;;  %v2576_v13 = vld [vmem:[%s3773_s2 + $0x130] sm:$0xff] }
  0x1f   : > { %435 = vmatpush.msra.mxu2 %v2209_v23  ;;  %3868 = vst [vmem:[#allocation20_spill] sm:$0xff] %v2388_v55  ;;  %v2532_v23 = vld [vmem:[%s3773_s2 + $0xc0] sm:$0xff]  ;;  %v2648_v9 = vld [vmem:[%s3773_s2 + $0x110] sm:$0xff] }
  0x20   : > { %356 = vmatpush.msra.mxu0 %v2222_v25  ;;  %394 = vmatpush.msra.mxu1 %v2337_v42  ;;  %3869 = vst [vmem:[#allocation21_spill] sm:$0xff] %v2400_v57  ;;  %v2611_v11 = vld [vmem:[%s3773_s2 + $0x120] sm:$0xff] }
  0x21   : > { %436 = vmatpush.msra.mxu2 %v2227_v26  ;;  %3870 = vst [vmem:[#allocation22_spill] sm:$0xff] %v2410_v61  ;;  %v2521_v26 = vld [vmem:[%s3773_s2 + $0x148] sm:$0xff] }
  0x22   : > { %357 = vmatpush.msra.mxu0 %v2244_v28  ;;  %395 = vmatpush.msra.mxu1 %v2343_v43  ;;  %3871 = vst [vmem:[#allocation23_spill] sm:$0xff] %v2422_v50 }
  0x23   : > { %437 = vmatpush.msra.mxu2 %v2249_v29  ;;  %v2516_v29 = vld [vmem:[%s3773_s2 + $0xc8] sm:$0xff]  ;;  %3883 = vst [vmem:[#allocation35_spill] sm:$0xff] %v2532_v23 }
  0x24   : > { %358 = vmatpush.msra.mxu0 %v2262_v31  ;;  %396 = vmatpush.msra.mxu1 %v2350_v44  ;;  %3881 = vst [vmem:[#allocation33_spill] sm:$0xff] %v2516_v29 }
  0x25   : > { %438 = vmatpush.msra.mxu2 %v2267_v32  ;;  %v2481_v32 = vld [vmem:[%s3773_s2 + $0xd8] sm:$0xff]  ;;  %3884 = vst [vmem:[#allocation36_spill] sm:$0xff] %v2548_v17 }
  0x26   : > { %359 = vmatpush.msra.mxu0 %v2276_v33  ;;  %397 = vmatpush.msra.mxu1 %v2356_v45  ;;  %3877 = vst [vmem:[#allocation29_spill] sm:$0xff] %v2481_v32 }
  0x27   : > { %439 = vmatpush.msra.mxu2 %v2281_v34  ;;  %v322_v34 = vadd.s32 1, %v310_v51  ;;  %v2461_v51 = vld [vmem:[%s3773_s2 + $0x60] sm:$0xff]  ;;  %3897 = vst [vmem:[#allocation49_spill] sm:$0xff] %v2648_v9 }
  0x28   : > { %360 = vmatpush.msra.mxu0 %v2289_v35  ;;  %398 = vmatpush.msra.mxu1 %v2362_v46  ;;  %3875 = vst [vmem:[#allocation27_spill] sm:$0xff] %v2461_v51 }
  0x29   : > { %440 = vmatpush.msra.mxu2 %v2294_v36  ;;  %vm324_vm3 = vcmp.eq.s32.totalorder %v313_v53, %v322_v34  ;;  %v2476_v34 = vld [vmem:[%s3773_s2 + $0x58] sm:$0xff] }
  0x2a   : > { %361 = vmatpush.msra.mxu0 %v2308_v37  ;;  %399 = vmatpush.msra.mxu1 %v2368_v47  ;;  %3876 = vst [vmem:[#allocation28_spill] sm:$0xff] %v2476_v34 }
  0x2b   : > { %441 = vmatpush.msra.mxu2 %v2313_v38  ;;  %362 = vmatmul.f32.vlgmr.msra.gmra.mxu0 %v2318_v39  ;;  %v1714_v38 = vadd.s32 4294967295, %v311_v60 }
  0x2c   : > { %442 = vmatmul.f32.vlgmr.msra.gmra.mxu2 %v2318_v39  ;;  %400 = vmatpush.msra.mxu1 %v2374_v48 }
  0x2d   : > { %571 = vmatpush.msrb.mxu0 %v2388_v55  ;;  %v2424_v55 = vsel %vm316_vm0, 1.0, %v2017_v54  ;;  %vm317_vm2 = vcmp.eq.s32.totalorder %v313_v53, %v1714_v38  ;;  %v2455_v38 = vld [vmem:[%s3773_s2 + $0x68] sm:$0xff] }
  0x2e   : > { %401 = vmatpush.msra.mxu1 %v2380_v49  ;;  %v2442_v36 = vsel %vm317_vm2, 1.0, %v2017_v54  ;;  %3874 = vst [vmem:[#allocation26_spill] sm:$0xff] %v2455_v38 }
  0x2f   : > { %402 = vmatmul.f32.vlgmr.msra.gmra.mxu1 %v2318_v39  ;;  %572 = vmatpush.msrb.mxu0 %v2400_v57  ;;  %v2430_v57 = vld [vmem:[%s3773_s2 + $0x160] sm:$0xff] }
  0x30   : > { %611 = vmatpush.msrb.mxu1 %v2393_v56 }
  0x31   : > { %573 = vmatpush.msrb.mxu0 %v2410_v61  ;;  %v2440_v61 = vld [vmem:[%s3773_s2 + $0x78] sm:$0xff] }
  0x32   : > { %612 = vmatpush.msrb.mxu1 %v2405_v58  ;;  %3872 = vst [vmem:[#allocation24_spill] sm:$0xff] %v2440_v61 }
  0x33   : > { %365 = vmatmul.f32.gmra.mxu0 %v2325_v40 }
  0x34   : > { %445 = vmatmul.f32.gmra.mxu2 %v2325_v40  ;;  %613 = vmatpush.msrb.mxu1 %v2417_v62 }
  0x35   : > { %574 = vmatpush.msrb.mxu0 %v2422_v50 }
  0x36   : > { %614 = vmatpush.msrb.mxu1 %v2430_v57 }
  0x37   : > { %405 = vmatmul.f32.gmra.mxu1 %v2325_v40  ;;  %575 = vmatpush.msrb.mxu0 %v2481_v32  ;;  %v2511_v32 = vld [vmem:[%s3773_s2 + $0x48] sm:$0xff] }
  0x38   : > { %3880 = vst [vmem:[#allocation32_spill] sm:$0xff] %v2511_v32  ;;  %v2666_v40 = vld [vmem:[%s3773_s2 + $0x108] sm:$0xff] }
  0x39   : > { %3900 = vst [vmem:[#allocation52_spill] sm:$0xff] %v2666_v40 }
  0xa8   : > { %v363_v52 = vpop.f32.mrf.mxu0 }
  0xac   : > { %v403_v7 = vpop.f32.mrf.mxu1 }
  0xaf   : > { %v443_v59 = vpop.f32.mrf.mxu2 }
  0xb0   : > { %v366_v63 = vpop.f32.mrf.mxu0 }
  0xb1   : > { %470 = vmatpush.msra.mxu3 %v366_v63 }
  0xb3   : > { %471 = vmatpush.msra.mxu3 %v363_v52  ;;  %v2448_v52 = vld [vmem:[%s3773_s2 + $0x70] sm:$0xff] }
  0xb4   : > { %1751 = vmatmul.msk.f32.vlgmr.msra.gmra.mxu3 %vm449_vm1, %v2424_v55  ;;  %3873 = vst [vmem:[#allocation25_spill] sm:$0xff] %v2448_v52  ;;  %v406_v1 = vpop.f32.mrf.mxu1 }
  0xb7   : > { %v446_v63 = vpop.f32.mrf.mxu2 }
  0xb8   : > { %499 = vmatpush.msrb.mxu3 %v446_v63  ;;  %v323_v63 = vadd.s32 1, %v311_v60  ;;  %v2486_v60 = vld [vmem:[%s3773_s2 + $0x158] sm:$0xff] }
  0xb9   : > { %615 = vmatpush.msrb.mxu1 %v2486_v60 }
  0xba   : > { %500 = vmatpush.msrb.mxu3 %v443_v59  ;;  %v2464_v59 = vsel %vm324_vm3, 1.0, %v2017_v54  ;;  %vm325_vm4 = vcmp.eq.s32.totalorder %v313_v53, %v323_v63  ;;  %v2494_v53 = vld [vmem:[%s3773_s2 + $0x50] sm:$0xff] }
  0xbb   : > { %v2469_v50 = vsel %vm325_vm4, 1.0, %v2017_v54  ;;  %3878 = vst [vmem:[#allocation30_spill] sm:$0xff] %v2494_v53  ;;  %v2499_v54 = vld [vmem:[%s3773_s2 + $0xd0] sm:$0xff] }
  0xbc   : > { %531 = vmatpush.msra.mxu3 %v2440_v61  ;;  %3879 = vst [vmem:[#allocation31_spill] sm:$0xff] %v2499_v54  ;;  %v2504_v63 = vld [vmem:[%s3773_s2 + $0x150] sm:$0xff]  ;;  %576 = vmatpush.msrb.mxu0 %v2499_v54  ;;  %v2527_v54 = vld [vmem:[%s3773_s2 + $0x40] sm:$0xff] }
  0xbd   : > { %1752 = vmatmul.msk.f32.gmra.mxu3 %vm449_vm1, %v2442_v36  ;;  %616 = vmatpush.msrb.mxu1 %v2504_v63  ;;  %3882 = vst [vmem:[#allocation34_spill] sm:$0xff] %v2527_v54 }
  0xbe   : > { %532 = vmatpush.msra.mxu3 %v2448_v52  ;;  %577 = vmatpush.msrb.mxu0 %v2516_v29  ;;  %v2553_v29 = vld [vmem:[%s3773_s2 + $0xb8] sm:$0xff] }
  0xbf   : > { %617 = vmatpush.msrb.mxu1 %v2521_v26  ;;  %3885 = vst [vmem:[#allocation37_spill] sm:$0xff] %v2553_v29 }
  0xc0   : > { %533 = vmatpush.msra.mxu3 %v2455_v38  ;;  %578 = vmatpush.msrb.mxu0 %v2532_v23  ;;  %v2566_v23 = vld [vmem:[%s3773_s2 + $0x30] sm:$0xff]  ;;  %v2692_v38 = vld [vmem:[%s3778_s7] sm:$0xff] }
  0xc1   : > { %618 = vmatpush.msrb.mxu1 %v2539_v20  ;;  %3886 = vst [vmem:[#allocation38_spill] sm:$0xff] %v2566_v23  ;;  %v2695_v52 = vperm.slane %v2692_v38, 0 }
  0xc2   : > { %534 = vmatpush.msra.mxu3 %v2461_v51  ;;  %579 = vmatpush.msrb.mxu0 %v2553_v29  ;;  %v2583_v29 = vld [vmem:[%s3773_s2 + $0x28] sm:$0xff]  ;;  %v2684_v51 = vld [vmem:[%s3773_s2 + $0x100] sm:$0xff] }
  0xc3   : > { %3888 = vst [vmem:[#allocation40_spill] sm:$0xff] %v2583_v29 }
  0xc4   : > { %535 = vmatpush.msra.mxu3 %v2476_v34  ;;  %v2620_v34 = vld [vmem:[%s3773_s2 + $0x18] sm:$0xff]  ;;  %3903 = vst [vmem:[#allocation55_spill] sm:$0xff] %v2684_v51 }
  0xc5   : > { %1753 = vmatmul.msk.f32.vlgmr.msrb.gmra.mxu3 %vm449_vm1, %v2464_v59  ;;  %3892 = vst [vmem:[#allocation44_spill] sm:$0xff] %v2620_v34 }
  0xc6   : > { %536 = vmatpush.msra.mxu3 %v2494_v53  ;;  %v2593_v53 = vld [vmem:[%s3773_s2 + $0x128] sm:$0xff] }
  0xc8   : > { %537 = vmatpush.msra.mxu3 %v2511_v32  ;;  %v2558_v32 = vld [vmem:[%s3773_s2 + $0x138] sm:$0xff] }
  0xc9   : > { %619 = vmatpush.msrb.mxu1 %v2558_v32 }
  0xca   : > { %538 = vmatpush.msra.mxu3 %v2527_v54  ;;  %v2571_v54 = vld [vmem:[%s3773_s2 + $0xb0] sm:$0xff] }
  0xcb   : > { %3887 = vst [vmem:[#allocation39_spill] sm:$0xff] %v2571_v54  ;;  %580 = vmatpush.msrb.mxu0 %v2571_v54  ;;  %620 = vmatpush.msrb.mxu1 %v2576_v13  ;;  %v2599_v54 = vld [vmem:[%s3773_s2 + $0x20] sm:$0xff] }
  0xcc   : > { %539 = vmatpush.msra.mxu3 %v2548_v17  ;;  %v2588_v17 = vld [vmem:[%s3773_s2 + $0xa8] sm:$0xff]  ;;  %3890 = vst [vmem:[#allocation42_spill] sm:$0xff] %v2599_v54 }
  0xcd   : > { %1754 = vmatmul.msk.f32.gmra.mxu3 %vm449_vm1, %v2469_v50  ;;  %3889 = vst [vmem:[#allocation41_spill] sm:$0xff] %v2588_v17  ;;  %581 = vmatpush.msrb.mxu0 %v2588_v17  ;;  %v2625_v17 = vld [vmem:[%s3773_s2 + $0x98] sm:$0xff] }
  0xce   : > { %540 = vmatpush.msra.mxu3 %v2566_v23  ;;  %v2604_v23 = vld [vmem:[%s3773_s2 + $0xa0] sm:$0xff]  ;;  %621 = vmatpush.msrb.mxu1 %v2593_v53  ;;  %3893 = vst [vmem:[#allocation45_spill] sm:$0xff] %v2625_v17 }
  0xcf   : > { %3891 = vst [vmem:[#allocation43_spill] sm:$0xff] %v2604_v23  ;;  %582 = vmatpush.msrb.mxu0 %v2604_v23  ;;  %v2638_v23 = vld [vmem:[%s3773_s2 + $0x10] sm:$0xff] }
  0xd0   : > { %541 = vmatpush.msra.mxu3 %v2583_v29  ;;  %622 = vmatpush.msrb.mxu1 %v2611_v11  ;;  %v2630_v29 = vld [vmem:[%s3773_s2 + $0x118] sm:$0xff]  ;;  %3895 = vst [vmem:[#allocation47_spill] sm:$0xff] %v2638_v23 }
  0xd1   : > { %3894 = vst [vmem:[#allocation46_spill] sm:$0xff] %v2630_v29  ;;  %583 = vmatpush.msrb.mxu0 %v2625_v17  ;;  %v2656_v17 = vld [vmem:[%s3773_s2 + $0x8] sm:$0xff] }
  0xd2   : > { %542 = vmatpush.msra.mxu3 %v2599_v54  ;;  %623 = vmatpush.msrb.mxu1 %v2630_v29  ;;  %v2643_v54 = vld [vmem:[%s3773_s2 + $0x90] sm:$0xff]  ;;  %3898 = vst [vmem:[#allocation50_spill] sm:$0xff] %v2656_v17 }
  0xd3   : > { %3896 = vst [vmem:[#allocation48_spill] sm:$0xff] %v2643_v54  ;;  %584 = vmatpush.msrb.mxu0 %v2643_v54  ;;  %v2674_v54 = vld [vmem:[%s3773_s2] sm:$0xff] }
  0xd4   : > { %543 = vmatpush.msra.mxu3 %v2620_v34  ;;  %624 = vmatpush.msrb.mxu1 %v2648_v9  ;;  %v2661_v34 = vld [vmem:[%s3773_s2 + $0x88] sm:$0xff]  ;;  %3901 = vst [vmem:[#allocation53_spill] sm:$0xff] %v2674_v54 }
  0xd5   : > { %3899 = vst [vmem:[#allocation51_spill] sm:$0xff] %v2661_v34  ;;  %585 = vmatpush.msrb.mxu0 %v2661_v34 }
  0xd6   : > { %544 = vmatpush.msra.mxu3 %v2638_v23  ;;  %625 = vmatpush.msrb.mxu1 %v2666_v40  ;;  %v2679_v23 = vld [vmem:[%s3773_s2 + $0x80] sm:$0xff] }
  0xd7   : > { %3902 = vst [vmem:[#allocation54_spill] sm:$0xff] %v2679_v23  ;;  %586 = vmatpush.msrb.mxu0 %v2679_v23 }
  0xd8   : > { %545 = vmatpush.msra.mxu3 %v2656_v17  ;;  %626 = vmatpush.msrb.mxu1 %v2684_v51 }
  0xda   : > { %546 = vmatpush.msra.mxu3 %v2674_v54 }
 0x137   : > { %v473_v34 = vpop.f32.mrf.mxu3 }
 0x138   : > { %v474_v5 = vadd.f32 %v473_v34, %v403_v7 }
 0x140   : > { %v476_v17 = vpop.f32.mrf.mxu3 }
 0x141   : > { %v477_v39 = vadd.f32 %v476_v17, %v406_v1  ;;  %v2707_v1 = vld [vmem:[%s3774_s3 + $0x70] sm:$0xff]  ;;  %v2719_v17 = vld [vmem:[%s3774_s3 + $0x60] sm:$0xff] }
 0x148   : > { %v502_v3 = vpop.f32.mrf.mxu3 }
 0x149   : > { %v508_v61 = vadd.f32 %v502_v3, %v474_v5  ;;  %v2702_v3 = vld [vmem:[%s3774_s3 + $0x78] sm:$0xff]  ;;  %v2713_v5 = vld [vmem:[%s3774_s3 + $0x68] sm:$0xff] }
 0x14a   : > { %704 = vmatpush.msrb.mxu3 %v2702_v3 }
 0x14b   : > { %v511_v54 = vadd.f32 %v2695_v52, %v508_v61 }
 0x14c   : > { %705 = vmatpush.msrb.mxu3 %v2707_v1 }
 0x14d   : > { %v513_v23 = vmax.f32 %v511_v54, 0.0  ;;  %v1799_v54 = vld [vmem:[%s3775_s4 + $0xc0] sm:$0xff] }
 0x14e   : > { %706 = vmatpush.msrb.mxu3 %v2713_v5 }
 0x14f   : > { %547 = vmatmul.f32.vlgmr.msra.gmra.mxu3 %v513_v23  ;;  %587 = vmatmul.f32.vlgmr.msrb.gmra.mxu0 %v513_v23 }
 0x150   : > { %627 = vmatmul.f32.vlgmr.msrb.gmra.mxu1 %v513_v23  ;;  %v505_v51 = vpop.f32.mrf.mxu3  ;;  %707 = vmatpush.msrb.mxu3 %v2719_v17 }
 0x151   : > { %v509_v40 = vadd.f32 %v505_v51, %v477_v39  ;;  %v1802_v39 = vld [vmem:[%s3775_s4 + $0xd8] sm:$0xff]  ;;  %v1800_v51 = vld [vmem:[%s3775_s4 + $0xc8] sm:$0xff] }
 0x153   : > { %v512_v9 = vadd.f32 %v2695_v52, %v509_v40  ;;  %v1801_v40 = vld [vmem:[%s3775_s4 + $0xd0] sm:$0xff] }
 0x155   : > { %v514_v29 = vmax.f32 %v512_v9, 0.0 }
 0x157   : > { %550 = vmatmul.f32.gmra.mxu3 %v514_v29  ;;  %590 = vmatmul.f32.gmra.mxu0 %v514_v29 }
 0x158   : > { %630 = vmatmul.f32.gmra.mxu1 %v514_v29  ;;  %v1806_v29 = vld [vmem:[%s3775_s4 + $0xf8] sm:$0xff] }
 0x159   : > { %764 = vmatpush.msra.mxu0 %v1806_v29  ;;  %v737_v29 = vld [vmem:[%s3775_s4 + $0x30] sm:$0xff] }
 0x1cd   : > { %v628_v34 = vpop.f32.mrf.mxu1 }
 0x1d2   : > { %v548_v7 = vpop.f32.mrf.mxu3 }
 0x1d5   : > { %v631_v23 = vpop.f32.mrf.mxu1 }
 0x1da   : > { %v551_v9 = vpop.f32.mrf.mxu3 }
 0x1db   : > { %648 = vmatpush.msrb.mxu2 %v551_v9 }
 0x1dd   : > { %649 = vmatpush.msrb.mxu2 %v548_v7  ;;  %v588_v7 = vpop.f32.mrf.mxu0 }
 0x1de   : > { %1787 = vmatmul.msk.f32.vlgmr.msrb.gmra.mxu2 %vm449_vm1, %v2424_v55 }
 0x1df   : > { %671 = vmatpush.msra.mxu2 %v631_v23  ;;  %v2885_v23 = vperm.slane %v2692_v38, 1 }
 0x1e1   : > { %672 = vmatpush.msra.mxu2 %v628_v34  ;;  %v1798_v34 = vld [vmem:[%s3775_s4 + $0xb8] sm:$0xff] }
 0x1e3   : > { %815 = vmatpush.msrb.mxu2 %v2074_v0  ;;  %v2750_v0 = vld [vmem:[%s3774_s3 + $0x58] sm:$0xff] }
 0x1e4   : > { %708 = vmatpush.msrb.mxu3 %v2750_v0 }
 0x1e5   : > { %816 = vmatpush.msrb.mxu2 %v2084_v2  ;;  %v2756_v2 = vld [vmem:[%s3774_s3 + $0x50] sm:$0xff] }
 0x1e6   : > { %1788 = vmatmul.msk.f32.gmra.mxu2 %vm449_vm1, %v2442_v36  ;;  %709 = vmatpush.msrb.mxu3 %v2756_v2 }
 0x1e7   : > { %817 = vmatpush.msrb.mxu2 %v2096_v4  ;;  %v2761_v4 = vld [vmem:[%s3774_s3 + $0x48] sm:$0xff] }
 0x1e8   : > { %710 = vmatpush.msrb.mxu3 %v2761_v4 }
 0x1e9   : > { %818 = vmatpush.msrb.mxu2 %v2108_v6  ;;  %v2767_v6 = vld [vmem:[%s3774_s3 + $0x40] sm:$0xff] }
 0x1ea   : > { %711 = vmatpush.msrb.mxu3 %v2767_v6 }
 0x1eb   : > { %819 = vmatpush.msrb.mxu2 %v2120_v8  ;;  %v2774_v8 = vld [vmem:[%s3774_s3 + $0x38] sm:$0xff] }
 0x1ec   : > { %712 = vmatpush.msrb.mxu3 %v2774_v8 }
 0x1ed   : > { %820 = vmatpush.msrb.mxu2 %v2132_v10  ;;  %v2780_v10 = vld [vmem:[%s3774_s3 + $0x30] sm:$0xff] }
 0x1ee   : > { %1789 = vmatmul.msk.f32.vlgmr.msra.gmra.mxu2 %vm449_vm1, %v2464_v59  ;;  %713 = vmatpush.msrb.mxu3 %v2780_v10 }
 0x1ef   : > { %821 = vmatpush.msrb.mxu2 %v2144_v12  ;;  %v2785_v12 = vld [vmem:[%s3774_s3 + $0x28] sm:$0xff] }
 0x1f0   : > { %714 = vmatpush.msrb.mxu3 %v2785_v12 }
 0x1f1   : > { %822 = vmatpush.msrb.mxu2 %v2166_v16  ;;  %v2791_v16 = vld [vmem:[%s3774_s3 + $0x20] sm:$0xff] }
 0x1f2   : > { %715 = vmatpush.msrb.mxu3 %v2791_v16 }
 0x1f3   : > { %823 = vmatpush.msrb.mxu2 %v2184_v19  ;;  %v2798_v19 = vld [vmem:[%s3774_s3 + $0x18] sm:$0xff] }
 0x1f4   : > { %716 = vmatpush.msrb.mxu3 %v2798_v19 }
 0x1f5   : > { %824 = vmatpush.msrb.mxu2 %v2204_v22  ;;  %v2804_v22 = vld [vmem:[%s3774_s3 + $0x10] sm:$0xff] }
 0x1f6   : > { %1790 = vmatmul.msk.f32.gmra.mxu2 %vm449_vm1, %v2469_v50  ;;  %717 = vmatpush.msrb.mxu3 %v2804_v22 }
 0x1f7   : > { %825 = vmatpush.msrb.mxu2 %v2222_v25  ;;  %v2810_v25 = vld [vmem:[%s3774_s3 + $0x8] sm:$0xff] }
 0x1f8   : > { %718 = vmatpush.msrb.mxu3 %v2810_v25 }
 0x1f9   : > { %826 = vmatpush.msrb.mxu2 %v2244_v28  ;;  %v2816_v28 = vld [vmem:[%s3774_s3] sm:$0xff] }
 0x1fa   : > { %719 = vmatpush.msrb.mxu3 %v2816_v28 }
 0x1fb   : > { %827 = vmatpush.msrb.mxu2 %v2262_v31  ;;  %v746_v31 = vld [vmem:[%s3775_s4 + $0x78] sm:$0xff] }
 0x1fc   : > { %838 = vmatpush.msra.mxu3 %v2156_v14  ;;  %787 = vmatpush.msra.mxu1 %v746_v31  ;;  %v745_v14 = vld [vmem:[%s3775_s4 + $0x70] sm:$0xff] }
 0x1fd   : > { %828 = vmatpush.msrb.mxu2 %v2276_v33  ;;  %v1805_v33 = vld [vmem:[%s3775_s4 + $0xf0] sm:$0xff] }
 0x1fe   : > { %839 = vmatpush.msra.mxu3 %v2161_v15  ;;  %v1804_v15 = vld [vmem:[%s3775_s4 + $0xe8] sm:$0xff]  ;;  %765 = vmatpush.msra.mxu0 %v1805_v33 }
 0x1ff   : > { %829 = vmatpush.msrb.mxu2 %v2289_v35  ;;  %788 = vmatpush.msra.mxu1 %v745_v14  ;;  %v1796_v33 = vld [vmem:[%s3775_s4 + $0xa8] sm:$0xff] }
 0x200   : > { %840 = vmatpush.msra.mxu3 %v2179_v18  ;;  %v744_v18 = vld [vmem:[%s3775_s4 + $0x68] sm:$0xff]  ;;  %766 = vmatpush.msra.mxu0 %v1804_v15  ;;  %v735_v15 = vld [vmem:[%s3775_s4 + $0x20] sm:$0xff] }
 0x201   : > { %830 = vmatpush.msrb.mxu2 %v2308_v37  ;;  %v743_v37 = vld [vmem:[%s3775_s4 + $0x60] sm:$0xff]  ;;  %789 = vmatpush.msra.mxu1 %v744_v18 }
 0x202   : > { %841 = vmatpush.msra.mxu3 %v2199_v21  ;;  %v1803_v21 = vld [vmem:[%s3775_s4 + $0xe0] sm:$0xff] }
 0x203   : > { %767 = vmatpush.msra.mxu0 %v1803_v21  ;;  %790 = vmatpush.msra.mxu1 %v743_v37 }
 0x204   : > { %842 = vmatpush.msra.mxu3 %v2217_v24  ;;  %v742_v24 = vld [vmem:[%s3775_s4 + $0x58] sm:$0xff] }
 0x205   : > { %768 = vmatpush.msra.mxu0 %v1802_v39  ;;  %791 = vmatpush.msra.mxu1 %v742_v24 }
 0x206   : > { %843 = vmatpush.msra.mxu3 %v2239_v27  ;;  %v741_v27 = vld [vmem:[%s3775_s4 + $0x50] sm:$0xff] }
 0x207   : > { %769 = vmatpush.msra.mxu0 %v1801_v40  ;;  %792 = vmatpush.msra.mxu1 %v741_v27  ;;  %v733_v40 = vld [vmem:[%s3775_s4 + $0x10] sm:$0xff]  ;;  %v1792_v27 = vld [vmem:[%s3775_s4 + $0x88] sm:$0xff] }
 0x208   : > { %844 = vmatpush.msra.mxu3 %v2257_v30  ;;  %v740_v30 = vld [vmem:[%s3775_s4 + $0x48] sm:$0xff] }
 0x209   : > { %770 = vmatpush.msra.mxu0 %v1800_v51  ;;  %793 = vmatpush.msra.mxu1 %v740_v30  ;;  %v1791_v51 = vld [vmem:[%s3775_s4 + $0x80] sm:$0xff] }
 0x20a   : > { %845 = vmatpush.msra.mxu3 %v2332_v41  ;;  %v739_v41 = vld [vmem:[%s3775_s4 + $0x40] sm:$0xff] }
 0x20b   : > { %771 = vmatpush.msra.mxu0 %v1799_v54  ;;  %794 = vmatpush.msra.mxu1 %v739_v41  ;;  %v731_v30 = vld [vmem:[%s3775_s4] sm:$0xff] }
 0x20c   : > { %846 = vmatpush.msra.mxu3 %v2337_v42  ;;  %v738_v42 = vld [vmem:[%s3775_s4 + $0x38] sm:$0xff]  ;;  %v3908_v54 = vld [vmem:[#allocation18_spill] sm:$0xff] }
 0x20d   : > { %772 = vmatpush.msra.mxu0 %v1798_v34  ;;  %795 = vmatpush.msra.mxu1 %v738_v42  ;;  %v3909_v41 = vld [vmem:[#allocation2_spill] sm:$0xff]  ;;  %v3911_v34 = vld [vmem:[#allocation3_spill] sm:$0xff]  ;;  %v3912_v42 = vld [vmem:[#allocation25_spill] sm:$0xff] }
 0x20e   : > { %847 = vmatpush.msra.mxu3 %v2343_v43  ;;  %v1797_v43 = vld [vmem:[%s3775_s4 + $0xb0] sm:$0xff] }
 0x20f   : > { %773 = vmatpush.msra.mxu0 %v1797_v43  ;;  %796 = vmatpush.msra.mxu1 %v737_v29  ;;  %v3914_v43 = vld [vmem:[#allocation26_spill] sm:$0xff]  ;;  %v3915_v29 = vld [vmem:[#allocation5_spill] sm:$0xff] }
 0x210   : > { %848 = vmatpush.msra.mxu3 %v2350_v44 }
 0x211   : > { %774 = vmatpush.msra.mxu0 %v1796_v33  ;;  %v3918_v33 = vld [vmem:[#allocation6_spill] sm:$0xff] }
 0x212   : > { %849 = vmatpush.msra.mxu3 %v2356_v45  ;;  %v1795_v45 = vld [vmem:[%s3775_s4 + $0xa0] sm:$0xff] }
 0x213   : > { %775 = vmatpush.msra.mxu0 %v1795_v45  ;;  %v3921_v45 = vld [vmem:[#allocation30_spill] sm:$0xff] }
 0x214   : > { %850 = vmatpush.msra.mxu3 %v2362_v46  ;;  %v591_v46 = vpop.f32.mrf.mxu0 }
 0x216   : > { %851 = vmatpush.msra.mxu3 %v2368_v47 }
 0x218   : > { %852 = vmatpush.msra.mxu3 %v2374_v48  ;;  %v3904_v48 = vld [vmem:[#allocation46_spill] sm:$0xff] }
 0x21a   : > { %853 = vmatpush.msra.mxu3 %v2380_v49  ;;  %v3905_v49 = vld [vmem:[#allocation49_spill] sm:$0xff] }
 0x261   : > { %v651_v35 = vpop.f32.mrf.mxu2 }
 0x262   : > { %v652_v9 = vadd.f32 %v651_v35, %v588_v7  ;;  %v736_v35 = vld [vmem:[%s3775_s4 + $0x28] sm:$0xff]  ;;  %v3910_v7 = vld [vmem:[#allocation24_spill] sm:$0xff] }
 0x263   : > { %797 = vmatpush.msra.mxu1 %v736_v35  ;;  %v3919_v35 = vld [vmem:[#allocation28_spill] sm:$0xff] }
 0x265   : > { %798 = vmatpush.msra.mxu1 %v735_v15  ;;  %v3922_v15 = vld [vmem:[#allocation8_spill] sm:$0xff] }
 0x269   : > { %v654_v61 = vpop.f32.mrf.mxu2 }
 0x26a   : > { %v655_v21 = vadd.f32 %v654_v61, %v591_v46  ;;  %v732_v61 = vld [vmem:[%s3775_s4 + $0x8] sm:$0xff]  ;;  %v3924_v46 = vld [vmem:[#allocation9_spill] sm:$0xff] }
 0x271   : > { %v674_v31 = vpop.f32.mrf.mxu2 }
 0x272   : > { %v680_v44 = vadd.f32 %v674_v31, %v652_v9  ;;  %v3913_v9 = vld [vmem:[#allocation4_spill] sm:$0xff]  ;;  %v3916_v31 = vld [vmem:[#allocation27_spill] sm:$0xff] }
 0x274   : > { %v683_v14 = vadd.f32 %v2885_v23, %v680_v44  ;;  %v3917_v44 = vld [vmem:[#allocation19_spill] sm:$0xff] }
 0x276   : > { %v685_v18 = vmax.f32 %v683_v14, 0.0  ;;  %v3920_v14 = vld [vmem:[#allocation7_spill] sm:$0xff] }
 0x278   : > { %720 = vmatmul.f32.vlgmr.msrb.gmra.mxu3 %v685_v18  ;;  %v3923_v18 = vld [vmem:[#allocation32_spill] sm:$0xff] }
 0x279   : > { %v677_v37 = vpop.f32.mrf.mxu2  ;;  %982 = vmatpush.msrb.mxu3 %v2393_v56  ;;  %v3906_v56 = vld [vmem:[#allocation52_spill] sm:$0xff] }
 0x27a   : > { %v681_v39 = vadd.f32 %v677_v37, %v655_v21  ;;  %v3925_v21 = vld [vmem:[#allocation34_spill] sm:$0xff] }
 0x27b   : > { %983 = vmatpush.msrb.mxu3 %v2405_v58  ;;  %v1794_v58 = vld [vmem:[%s3775_s4 + $0x98] sm:$0xff]  ;;  %v3926_v37 = vld [vmem:[#allocation10_spill] sm:$0xff] }
 0x27c   : > { %v684_v24 = vadd.f32 %v2885_v23, %v681_v39  ;;  %776 = vmatpush.msra.mxu0 %v1794_v58  ;;  %v3927_v39 = vld [vmem:[#allocation36_spill] sm:$0xff] }
 0x27d   : > { %984 = vmatpush.msrb.mxu3 %v2417_v62  ;;  %v734_v62 = vld [vmem:[%s3775_s4 + $0x18] sm:$0xff]  ;;  %v3930_v58 = vld [vmem:[#allocation12_spill] sm:$0xff] }
 0x27e   : > { %v686_v47 = vmax.f32 %v684_v24, 0.0  ;;  %799 = vmatpush.msra.mxu1 %v734_v62  ;;  %v3928_v24 = vld [vmem:[#allocation11_spill] sm:$0xff]  ;;  %v2976_v62 = vperm.slane %v2692_v38, 2 }
 0x27f   : > { %985 = vmatpush.msrb.mxu3 %v2430_v57  ;;  %v3907_v57 = vld [vmem:[#allocation55_spill] sm:$0xff] }
 0x280   : > { %723 = vmatmul.f32.gmra.mxu3 %v686_v47  ;;  %800 = vmatpush.msra.mxu1 %v733_v40  ;;  %v3929_v47 = vld [vmem:[#allocation38_spill] sm:$0xff]  ;;  %v3932_v40 = vld [vmem:[#allocation13_spill] sm:$0xff] }
 0x281   : > { %986 = vmatpush.msrb.mxu3 %v2486_v60  ;;  %v1793_v60 = vld [vmem:[%s3775_s4 + $0x90] sm:$0xff] }
 0x282   : > { %777 = vmatpush.msra.mxu0 %v1793_v60  ;;  %801 = vmatpush.msra.mxu1 %v732_v61  ;;  %v3931_v60 = vld [vmem:[#allocation40_spill] sm:$0xff] }
 0x283   : > { %987 = vmatpush.msrb.mxu3 %v2504_v63 }
 0x284   : > { %778 = vmatpush.msra.mxu0 %v1792_v27  ;;  %802 = vmatpush.msra.mxu1 %v731_v30  ;;  %v3933_v27 = vld [vmem:[#allocation42_spill] sm:$0xff] }
 0x285   : > { %988 = vmatpush.msrb.mxu3 %v2521_v26  ;;  %803 = vmatmul.f32.vlgmr.msra.gmra.mxu1 %v3908_v54 }
 0x286   : > { %779 = vmatpush.msra.mxu0 %v1791_v51  ;;  %936 = vmatpush.msrb.mxu1 %v3910_v7  ;;  %v3934_v51 = vld [vmem:[#allocation14_spill] sm:$0xff]  ;;  %v3936_v7 = vld [vmem:[#allocation15_spill] sm:$0xff] }
 0x287   : > { %989 = vmatpush.msrb.mxu3 %v2539_v20 }
 0x288   : > { %861 = vmatpush.msrb.mxu0 %v3909_v41  ;;  %937 = vmatpush.msrb.mxu1 %v3912_v42  ;;  %v3935_v41 = vld [vmem:[#allocation44_spill] sm:$0xff]  ;;  %v3937_v42 = vld [vmem:[#allocation47_spill] sm:$0xff] }
 0x289   : > { %990 = vmatpush.msrb.mxu3 %v2558_v32 }
 0x28a   : > { %862 = vmatpush.msrb.mxu0 %v3911_v34  ;;  %938 = vmatpush.msrb.mxu1 %v3914_v43 }
 0x28b   : > { %991 = vmatpush.msrb.mxu3 %v2576_v13 }
 0x28c   : > { %863 = vmatpush.msrb.mxu0 %v3913_v9  ;;  %939 = vmatpush.msrb.mxu1 %v3916_v31  ;;  %v3938_v9 = vld [vmem:[#allocation16_spill] sm:$0xff]  ;;  %v3940_v31 = vld [vmem:[#allocation17_spill] sm:$0xff] }
 0x28d   : > { %992 = vmatpush.msrb.mxu3 %v2593_v53  ;;  %806 = vmatmul.f32.gmra.mxu1 %v3917_v44 }
 0x28e   : > { %864 = vmatpush.msrb.mxu0 %v3915_v29  ;;  %940 = vmatpush.msrb.mxu1 %v3919_v35  ;;  %v3939_v29 = vld [vmem:[#allocation50_spill] sm:$0xff] }
 0x28f   : > { %993 = vmatpush.msrb.mxu3 %v2611_v11 }
 0x290   : > { %865 = vmatpush.msrb.mxu0 %v3918_v33  ;;  %941 = vmatpush.msrb.mxu1 %v3921_v45  ;;  %v3941_v33 = vld [vmem:[#allocation53_spill] sm:$0xff] }
 0x291   : > { %994 = vmatpush.msrb.mxu3 %v3904_v48 }
 0x292   : > { %866 = vmatpush.msrb.mxu0 %v3920_v14  ;;  %942 = vmatpush.msrb.mxu1 %v3923_v18  ;;  %v3945_v18 = vld [vmem:[#allocation23_spill] sm:$0xff] }
 0x293   : > { %995 = vmatpush.msrb.mxu3 %v3905_v49 }
 0x294   : > { %867 = vmatpush.msrb.mxu0 %v3922_v15  ;;  %943 = vmatpush.msrb.mxu1 %v3925_v21  ;;  %v3944_v15 = vld [vmem:[#allocation22_spill] sm:$0xff]  ;;  %v3947_v21 = vld [vmem:[#allocation31_spill] sm:$0xff] }
 0x295   : > { %996 = vmatpush.msrb.mxu3 %v3906_v56 }
 0x296   : > { %868 = vmatpush.msrb.mxu0 %v3924_v46  ;;  %944 = vmatpush.msrb.mxu1 %v3927_v39  ;;  %v3946_v46 = vld [vmem:[#allocation29_spill] sm:$0xff]  ;;  %v3949_v39 = vld [vmem:[#allocation35_spill] sm:$0xff] }
 0x297   : > { %997 = vmatpush.msrb.mxu3 %v3907_v57 }
 0x298   : > { %869 = vmatpush.msrb.mxu0 %v3926_v37  ;;  %945 = vmatpush.msrb.mxu1 %v3929_v47  ;;  %v3948_v37 = vld [vmem:[#allocation33_spill] sm:$0xff]  ;;  %v3951_v47 = vld [vmem:[#allocation39_spill] sm:$0xff] }
 0x29a   : > { %870 = vmatpush.msrb.mxu0 %v3928_v24  ;;  %946 = vmatpush.msrb.mxu1 %v3931_v60  ;;  %v3950_v24 = vld [vmem:[#allocation37_spill] sm:$0xff]  ;;  %v3953_v60 = vld [vmem:[#allocation43_spill] sm:$0xff] }
 0x29c   : > { %871 = vmatpush.msrb.mxu0 %v3930_v58  ;;  %947 = vmatpush.msrb.mxu1 %v3933_v27  ;;  %v3952_v58 = vld [vmem:[#allocation41_spill] sm:$0xff]  ;;  %v3955_v27 = vld [vmem:[#allocation48_spill] sm:$0xff] }
 0x29e   : > { %872 = vmatpush.msrb.mxu0 %v3932_v40  ;;  %948 = vmatpush.msrb.mxu1 %v3935_v41  ;;  %v3954_v40 = vld [vmem:[#allocation45_spill] sm:$0xff] }
 0x29f   : > { %v1099_v41 = vld [vmem:[%s3776_s5 + $0x78] sm:$0xff] }
 0x2a0   : > { %873 = vmatpush.msrb.mxu0 %v3934_v51  ;;  %949 = vmatpush.msrb.mxu1 %v3937_v42  ;;  %v3957_v51 = vld [vmem:[#allocation54_spill] sm:$0xff]  ;;  %v1828_v42 = vld [vmem:[%s3776_s5 + $0xe8] sm:$0xff] }
 0x2a2   : > { %874 = vmatpush.msrb.mxu0 %v3936_v7  ;;  %950 = vmatpush.msrb.mxu1 %v3939_v29  ;;  %v1829_v7 = vld [vmem:[%s3776_s5 + $0xf0] sm:$0xff]  ;;  %v1827_v29 = vld [vmem:[%s3776_s5 + $0xe0] sm:$0xff] }
 0x2a4   : > { %875 = vmatpush.msrb.mxu0 %v3938_v9  ;;  %951 = vmatpush.msrb.mxu1 %v3941_v33  ;;  %v1097_v9 = vld [vmem:[%s3776_s5 + $0x68] sm:$0xff]  ;;  %v1826_v33 = vld [vmem:[%s3776_s5 + $0xd8] sm:$0xff] }
 0x2a6   : > { %876 = vmatpush.msrb.mxu0 %v3940_v31  ;;  %1057 = vmatpush.msra.mxu1 %v2702_v3  ;;  %v1096_v31 = vld [vmem:[%s3776_s5 + $0x60] sm:$0xff] }
 0x2a8   : > { %1058 = vmatpush.msra.mxu1 %v2707_v1  ;;  %v810_v1 = vperm.slane %v2692_v38, 3 }
 0x2aa   : > { %1059 = vmatpush.msra.mxu1 %v2713_v5 }
 0x2ac   : > { %1060 = vmatpush.msra.mxu1 %v2719_v17 }
 0x2ae   : > { %1061 = vmatpush.msra.mxu1 %v2750_v0 }
 0x2b0   : > { %1062 = vmatpush.msra.mxu1 %v2756_v2 }
 0x2b2   : > { %1063 = vmatpush.msra.mxu1 %v2761_v4 }
 0x2b4   : > { %1064 = vmatpush.msra.mxu1 %v2767_v6 }
 0x2b6   : > { %1065 = vmatpush.msra.mxu1 %v2774_v8 }
 0x2b8   : > { %1066 = vmatpush.msra.mxu1 %v2780_v10 }
 0x2ba   : > { %1067 = vmatpush.msra.mxu1 %v2785_v12 }
 0x2bc   : > { %1068 = vmatpush.msra.mxu1 %v2791_v16 }
 0x2be   : > { %1069 = vmatpush.msra.mxu1 %v2798_v19 }
 0x2c0   : > { %1070 = vmatpush.msra.mxu1 %v2804_v22 }
 0x2c2   : > { %1071 = vmatpush.msra.mxu1 %v2810_v25  ;;  %v3942_v25 = vld [vmem:[#allocation20_spill] sm:$0xff] }
 0x2c4   : > { %1072 = vmatpush.msra.mxu1 %v2816_v28 }
 0x2fb   : > { %v721_v61 = vpop.f32.mrf.mxu3 }
 0x2fc   : > { %v722_v30 = vadd.f32 %v721_v61, %v2976_v62  ;;  %v3956_v61 = vld [vmem:[#allocation51_spill] sm:$0xff] }
 0x2fe   : > { %v727_v34 = vadd.f32 %v722_v30, %v3908_v54  ;;  %v1830_v30 = vld [vmem:[%s3776_s5 + $0xf8] sm:$0xff] }
 0x300   : > { %v2988_v43 = vmax.f32 %v727_v34, 0.0  ;;  %v1098_v34 = vld [vmem:[%s3776_s5 + $0x70] sm:$0xff] }
 0x302   : > { %780 = vmatmul.f32.vlgmr.msra.gmra.mxu0 %v2988_v43  ;;  %v804_v3 = vpop.f32.mrf.mxu1 }
 0x303   : > { %v724_v35 = vpop.f32.mrf.mxu3 }
 0x304   : > { %v725_v14 = vadd.f32 %v724_v35, %v2976_v62  ;;  %v1095_v35 = vld [vmem:[%s3776_s5 + $0x58] sm:$0xff] }
 0x306   : > { %v728_v54 = vadd.f32 %v725_v14, %v3917_v44  ;;  %v3943_v44 = vld [vmem:[#allocation21_spill] sm:$0xff]  ;;  %v1825_v14 = vld [vmem:[%s3776_s5 + $0xd0] sm:$0xff] }
 0x308   : > { %v2999_v45 = vmax.f32 %v728_v54, 0.0  ;;  %v1094_v54 = vld [vmem:[%s3776_s5 + $0x50] sm:$0xff] }
 0x30a   : > { %783 = vmatmul.f32.gmra.mxu0 %v2999_v45  ;;  %v807_v4 = vpop.f32.mrf.mxu1 }
 0x37f   : > { %v781_v5 = vpop.f32.mrf.mxu0 }
 0x380   : > { %v805_v17 = vadd.f32 %v804_v3, %v781_v5  ;;  %v1824_v3 = vld [vmem:[%s3776_s5 + $0xc8] sm:$0xff]  ;;  %v1823_v5 = vld [vmem:[%s3776_s5 + $0xc0] sm:$0xff] }
 0x382   : > { %v811_v0 = vadd.f32 %v810_v1, %v805_v17  ;;  %v1092_v17 = vld [vmem:[%s3776_s5 + $0x40] sm:$0xff] }
 0x384   : > { %v3016_v2 = vmax.f32 %v811_v0, 0.0  ;;  %v1822_v0 = vld [vmem:[%s3776_s5 + $0xb8] sm:$0xff] }
 0x386   : > { %831 = vmatmul.f32.vlgmr.msrb.gmra.mxu2 %v3016_v2  ;;  %854 = vmatmul.f32.vlgmr.msra.gmra.mxu3 %v3016_v2 }
 0x387   : > { %877 = vmatmul.f32.vlgmr.msrb.gmra.mxu0 %v3016_v2  ;;  %v784_v6 = vpop.f32.mrf.mxu0  ;;  %1140 = vmatpush.msra.mxu3 %v1099_v41  ;;  %v1084_v41 = vld [vmem:[%s3776_s5] sm:$0xff] }
 0x388   : > { %v808_v8 = vadd.f32 %v807_v4, %v784_v6  ;;  %v1091_v4 = vld [vmem:[%s3776_s5 + $0x38] sm:$0xff]  ;;  %v1821_v6 = vld [vmem:[%s3776_s5 + $0xb0] sm:$0xff] }
 0x389   : > { %1141 = vmatpush.msra.mxu3 %v1098_v34 }
 0x38a   : > { %v812_v10 = vadd.f32 %v810_v1, %v808_v8  ;;  %v1093_v1 = vld [vmem:[%s3776_s5 + $0x48] sm:$0xff]  ;;  %v1090_v8 = vld [vmem:[%s3776_s5 + $0x30] sm:$0xff] }
 0x38b   : > { %1142 = vmatpush.msra.mxu3 %v1097_v9 }
 0x38c   : > { %v3021_v12 = vmax.f32 %v812_v10, 0.0  ;;  %v1820_v10 = vld [vmem:[%s3776_s5 + $0xa8] sm:$0xff] }
 0x38d   : > { %1143 = vmatpush.msra.mxu3 %v1096_v31 }
 0x38e   : > { %834 = vmatmul.f32.gmra.mxu2 %v3021_v12  ;;  %857 = vmatmul.f32.gmra.mxu3 %v3021_v12 }
 0x38f   : > { %880 = vmatmul.f32.gmra.mxu0 %v3021_v12  ;;  %1144 = vmatpush.msra.mxu3 %v1095_v35 }
 0x391   : > { %1145 = vmatpush.msra.mxu3 %v1094_v54 }
 0x393   : > { %1146 = vmatpush.msra.mxu3 %v1093_v1 }
 0x395   : > { %1147 = vmatpush.msra.mxu3 %v1092_v17  ;;  %v1918_v17 = vld [vmem:[%s3772_s1 + $0x178] sm:$0xff] }
 0x397   : > { %1148 = vmatpush.msra.mxu3 %v1091_v4 }
 0x399   : > { %1149 = vmatpush.msra.mxu3 %v1090_v8  ;;  %v1921_v8 = vld [vmem:[%s3772_s1 + $0x170] sm:$0xff] }
 0x404   : > { %v878_v16 = vpop.f32.mrf.mxu0 }
 0x409   : > { %v832_v38 = vpop.f32.mrf.mxu2  ;;  %v855_v34 = vpop.f32.mrf.mxu3 }
 0x40c   : > { %v881_v22 = vpop.f32.mrf.mxu0 }
 0x411   : > { %v835_v19 = vpop.f32.mrf.mxu2  ;;  %v858_v35 = vpop.f32.mrf.mxu3 }
 0x412   : > { %898 = vmatpush.msra.mxu2 %v835_v19  ;;  %v1088_v19 = vld [vmem:[%s3776_s5 + $0x20] sm:$0xff] }
 0x414   : > { %899 = vmatpush.msra.mxu2 %v832_v38  ;;  %v1089_v38 = vld [vmem:[%s3776_s5 + $0x28] sm:$0xff] }
 0x415   : > { %1807 = vmatmul.msk.f32.vlgmr.msra.gmra.mxu2 %vm449_vm1, %v2424_v55  ;;  %1150 = vmatpush.msra.mxu3 %v1089_v38 }
 0x416   : > { %921 = vmatpush.msrb.mxu2 %v881_v22 }
 0x417   : > { %1151 = vmatpush.msra.mxu3 %v1088_v19  ;;  %v1924_v19 = vld [vmem:[%s3772_s1 + $0x168] sm:$0xff] }
 0x418   : > { %922 = vmatpush.msrb.mxu2 %v878_v16  ;;  %v1819_v16 = vld [vmem:[%s3776_s5 + $0xa0] sm:$0xff] }
 0x41a   : > { %959 = vmatpush.msra.mxu2 %v3942_v25  ;;  %v1818_v25 = vld [vmem:[%s3776_s5 + $0x98] sm:$0xff] }
 0x41c   : > { %960 = vmatpush.msra.mxu2 %v3943_v44  ;;  %v1087_v44 = vld [vmem:[%s3776_s5 + $0x18] sm:$0xff] }
 0x41d   : > { %1808 = vmatmul.msk.f32.gmra.mxu2 %vm449_vm1, %v2442_v36  ;;  %1152 = vmatpush.msra.mxu3 %v1087_v44  ;;  %v1927_v44 = vld [vmem:[%s3772_s1 + $0x160] sm:$0xff] }
 0x41e   : > { %961 = vmatpush.msra.mxu2 %v3944_v15  ;;  %v1817_v15 = vld [vmem:[%s3776_s5 + $0x90] sm:$0xff] }
 0x420   : > { %962 = vmatpush.msra.mxu2 %v3945_v18  ;;  %v1086_v18 = vld [vmem:[%s3776_s5 + $0x10] sm:$0xff] }
 0x421   : > { %1153 = vmatpush.msra.mxu3 %v1086_v18  ;;  %v1929_v18 = vld [vmem:[%s3772_s1 + $0xd8] sm:$0xff] }
 0x422   : > { %963 = vmatpush.msra.mxu2 %v3946_v46  ;;  %v1816_v46 = vld [vmem:[%s3776_s5 + $0x88] sm:$0xff] }
 0x424   : > { %964 = vmatpush.msra.mxu2 %v3947_v21  ;;  %v1085_v21 = vld [vmem:[%s3776_s5 + $0x8] sm:$0xff] }
 0x425   : > { %1809 = vmatmul.msk.f32.vlgmr.msrb.gmra.mxu2 %vm449_vm1, %v2464_v59  ;;  %1154 = vmatpush.msra.mxu3 %v1085_v21  ;;  %v1931_v21 = vld [vmem:[%s3772_s1 + $0x50] sm:$0xff] }
 0x426   : > { %965 = vmatpush.msra.mxu2 %v3948_v37 }
 0x427   : > { %1155 = vmatpush.msra.mxu3 %v1084_v41  ;;  %v1933_v41 = vld [vmem:[%s3772_s1 + $0x150] sm:$0xff] }
 0x428   : > { %966 = vmatpush.msra.mxu2 %v3949_v39 }
 0x42a   : > { %967 = vmatpush.msra.mxu2 %v3950_v24 }
 0x42c   : > { %968 = vmatpush.msra.mxu2 %v3951_v47 }
 0x42d   : > { %1810 = vmatmul.msk.f32.gmra.mxu2 %vm449_vm1, %v2469_v50 }
 0x42e   : > { %969 = vmatpush.msra.mxu2 %v3952_v58 }
 0x430   : > { %970 = vmatpush.msra.mxu2 %v3953_v60 }
 0x432   : > { %971 = vmatpush.msra.mxu2 %v3954_v40 }
 0x434   : > { %972 = vmatpush.msra.mxu2 %v3955_v27 }
 0x436   : > { %973 = vmatpush.msra.mxu2 %v3956_v61 }
 0x438   : > { %974 = vmatpush.msra.mxu2 %v3957_v51 }
 0x43a   : > { %1117 = vmatpush.msrb.mxu2 %v1830_v30  ;;  %v1815_v30 = vld [vmem:[%s3776_s5 + $0x80] sm:$0xff] }
 0x43c   : > { %1118 = vmatpush.msrb.mxu2 %v1829_v7 }
 0x43e   : > { %1119 = vmatpush.msrb.mxu2 %v1828_v42 }
 0x440   : > { %1120 = vmatpush.msrb.mxu2 %v1827_v29 }
 0x442   : > { %1121 = vmatpush.msrb.mxu2 %v1826_v33 }
 0x444   : > { %1122 = vmatpush.msrb.mxu2 %v1825_v14 }
 0x446   : > { %1123 = vmatpush.msrb.mxu2 %v1824_v3  ;;  %v1916_v3 = vld [vmem:[%s3772_s1 + $0x78] sm:$0xff] }
 0x448   : > { %1124 = vmatpush.msrb.mxu2 %v1823_v5  ;;  %v1917_v5 = vld [vmem:[%s3772_s1 + $0xf8] sm:$0xff] }
 0x44a   : > { %1125 = vmatpush.msrb.mxu2 %v1822_v0  ;;  %v1919_v0 = vld [vmem:[%s3772_s1 + $0x70] sm:$0xff] }
 0x44c   : > { %1126 = vmatpush.msrb.mxu2 %v1821_v6  ;;  %v1920_v6 = vld [vmem:[%s3772_s1 + $0xf0] sm:$0xff] }
 0x44e   : > { %1127 = vmatpush.msrb.mxu2 %v1820_v10  ;;  %v1922_v10 = vld [vmem:[%s3772_s1 + $0x68] sm:$0xff] }
 0x450   : > { %1128 = vmatpush.msrb.mxu2 %v1819_v16  ;;  %v1923_v16 = vld [vmem:[%s3772_s1 + $0xe8] sm:$0xff] }
 0x452   : > { %1129 = vmatpush.msrb.mxu2 %v1818_v25  ;;  %v1926_v25 = vld [vmem:[%s3772_s1 + $0xe0] sm:$0xff] }
 0x454   : > { %1130 = vmatpush.msrb.mxu2 %v1817_v15  ;;  %v1928_v15 = vld [vmem:[%s3772_s1 + $0x58] sm:$0xff] }
 0x456   : > { %1131 = vmatpush.msrb.mxu2 %v1816_v46  ;;  %v1930_v46 = vld [vmem:[%s3772_s1 + $0x158] sm:$0xff] }
 0x458   : > { %1132 = vmatpush.msrb.mxu2 %v1815_v30  ;;  %v1932_v30 = vld [vmem:[%s3772_s1 + $0xd0] sm:$0xff] }
 0x498   : > { %v901_v22 = vpop.f32.mrf.mxu2 }
 0x499   : > { %v902_v42 = vadd.f32 %v901_v22, %v855_v34  ;;  %v1925_v22 = vld [vmem:[%s3772_s1 + $0x60] sm:$0xff]  ;;  %v1935_v34 = vld [vmem:[%s3772_s1 + $0xc8] sm:$0xff] }
 0x4a0   : > { %v904_v7 = vpop.f32.mrf.mxu2 }
 0x4a1   : > { %v905_v14 = vadd.f32 %v904_v7, %v858_v35  ;;  %v1934_v7 = vld [vmem:[%s3772_s1 + $0x48] sm:$0xff]  ;;  %v1941_v35 = vld [vmem:[%s3772_s1 + $0x38] sm:$0xff] }
 0x4a8   : > { %v924_v9 = vpop.f32.mrf.mxu2 }
 0x4a9   : > { %v930_v29 = vadd.f32 %v924_v9, %v902_v42  ;;  %v1936_v42 = vld [vmem:[%s3772_s1 + $0x148] sm:$0xff]  ;;  %v3213_v9 = vld [vmem:[%s2301_s24] sm:$0xff] }
 0x4ab   : > { %v932_v31 = vadd.f32 %v930_v29, %v2695_v52  ;;  %v1938_v29 = vld [vmem:[%s3772_s1 + $0x40] sm:$0xff] }
 0x4ad   : > { %v934_v33 = vmax.f32 %v932_v31, 0.0  ;;  %v1939_v31 = vld [vmem:[%s3772_s1 + $0xc0] sm:$0xff] }
 0x4af   : > { %952 = vmatmul.f32.vlgmr.msrb.gmra.mxu1 %v934_v33  ;;  %975 = vmatmul.f32.vlgmr.msra.gmra.mxu2 %v934_v33 }
 0x4b0   : > { %998 = vmatmul.f32.vlgmr.msrb.gmra.mxu3 %v934_v33  ;;  %v927_v54 = vpop.f32.mrf.mxu2  ;;  %1210 = vmatpush.msrb.mxu1 %v1916_v3  ;;  %v1940_v33 = vld [vmem:[%s3772_s1 + $0x140] sm:$0xff]  ;;  %v1944_v3 = vld [vmem:[%s3772_s1 + $0x30] sm:$0xff] }
 0x4b1   : > { %v931_v1 = vadd.f32 %v927_v54, %v905_v14  ;;  %1233 = vmatpush.msra.mxu2 %v1917_v5  ;;  %1256 = vmatpush.msrb.mxu3 %v1918_v17  ;;  %v1942_v14 = vld [vmem:[%s3772_s1 + $0xb8] sm:$0xff]  ;;  %v1946_v5 = vld [vmem:[%s3772_s1 + $0x130] sm:$0xff]  ;;  %v1947_v17 = vld [vmem:[%s3772_s1 + $0x28] sm:$0xff] }
 0x4b2   : > { %1211 = vmatpush.msrb.mxu1 %v1919_v0  ;;  %v1943_v54 = vld [vmem:[%s3772_s1 + $0x138] sm:$0xff]  ;;  %v1948_v0 = vld [vmem:[%s3772_s1 + $0x128] sm:$0xff] }
 0x4b3   : > { %v933_v4 = vadd.f32 %v931_v1, %v2695_v52  ;;  %1234 = vmatpush.msra.mxu2 %v1920_v6  ;;  %1257 = vmatpush.msrb.mxu3 %v1921_v8  ;;  %v1945_v1 = vld [vmem:[%s3772_s1 + $0xb0] sm:$0xff]  ;;  %v1950_v6 = vld [vmem:[%s3772_s1 + $0xa8] sm:$0xff]  ;;  %v1951_v8 = vld [vmem:[%s3772_s1 + $0x20] sm:$0xff] }
 0x4b4   : > { %1212 = vmatpush.msrb.mxu1 %v1922_v10  ;;  %v1952_v10 = vld [vmem:[%s3772_s1 + $0x120] sm:$0xff] }
 0x4b5   : > { %v935_v38 = vmax.f32 %v933_v4, 0.0  ;;  %1235 = vmatpush.msra.mxu2 %v1923_v16  ;;  %1258 = vmatpush.msrb.mxu3 %v1924_v19  ;;  %v3251_v4 = vld [vmem:[%s2301_s24 + $0x8] sm:$0xff]  ;;  %v1954_v16 = vld [vmem:[%s3772_s1 + $0x18] sm:$0xff] }
 0x4b6   : > { %1213 = vmatpush.msrb.mxu1 %v1925_v22  ;;  %v1955_v19 = vld [vmem:[%s3772_s1 + $0x118] sm:$0xff] }
 0x4b7   : > { %955 = vmatmul.f32.gmra.mxu1 %v935_v38  ;;  %978 = vmatmul.f32.gmra.mxu2 %v935_v38  ;;  %v1956_v22 = vld [vmem:[%s3772_s1 + $0x98] sm:$0xff] }
 0x4b8   : > { %1001 = vmatmul.f32.gmra.mxu3 %v935_v38  ;;  %1236 = vmatpush.msra.mxu2 %v1926_v25  ;;  %v1953_v38 = vld [vmem:[%s3772_s1 + $0xa0] sm:$0xff]  ;;  %v1957_v25 = vld [vmem:[%s3772_s1 + $0x10] sm:$0xff] }
 0x4b9   : > { %1259 = vmatpush.msrb.mxu3 %v1927_v44  ;;  %1214 = vmatpush.msrb.mxu1 %v1928_v15  ;;  %v1958_v44 = vld [vmem:[%s3772_s1 + $0x110] sm:$0xff] }
 0x4ba   : > { %1237 = vmatpush.msra.mxu2 %v1929_v18  ;;  %v1959_v15 = vld [vmem:[%s3772_s1 + $0x90] sm:$0xff]  ;;  %v1960_v18 = vld [vmem:[%s3772_s1 + $0x8] sm:$0xff] }
 0x4bb   : > { %1260 = vmatpush.msrb.mxu3 %v1930_v46  ;;  %1215 = vmatpush.msrb.mxu1 %v1931_v21  ;;  %v1961_v46 = vld [vmem:[%s3772_s1 + $0x108] sm:$0xff] }
 0x4bc   : > { %1238 = vmatpush.msra.mxu2 %v1932_v30  ;;  %v1962_v21 = vld [vmem:[%s3772_s1 + $0x88] sm:$0xff]  ;;  %v1963_v30 = vld [vmem:[%s3772_s1] sm:$0xff] }
 0x4bd   : > { %1261 = vmatpush.msrb.mxu3 %v1933_v41  ;;  %1216 = vmatpush.msrb.mxu1 %v1934_v7  ;;  %v1964_v41 = vld [vmem:[%s3772_s1 + $0x100] sm:$0xff] }
 0x4be   : > { %1239 = vmatpush.msra.mxu2 %v1935_v34  ;;  %v1965_v7 = vld [vmem:[%s3772_s1 + $0x80] sm:$0xff]  ;;  %v1966_v34 = vld [vmem:[%s3773_s2 + $0x178] sm:$0xff] }
 0x4bf   : > { %1133 = vmatmul.f32.vlgmr.msrb.gmra.mxu2 %v2988_v43  ;;  %1262 = vmatpush.msrb.mxu3 %v1936_v42  ;;  %v1967_v42 = vld [vmem:[%s3773_s2 + $0xf8] sm:$0xff] }
 0x4c0   : > { %1156 = vmatmul.f32.vlgmr.msra.gmra.mxu3 %v3213_v9  ;;  %1217 = vmatpush.msrb.mxu1 %v1938_v29  ;;  %v1968_v29 = vld [vmem:[%s3773_s2 + $0x170] sm:$0xff] }
 0x4c1   : > { %1240 = vmatpush.msra.mxu2 %v1939_v31  ;;  %1263 = vmatpush.msrb.mxu3 %v1940_v33  ;;  %v1969_v31 = vld [vmem:[%s3773_s2 + $0xf0] sm:$0xff]  ;;  %v1970_v33 = vld [vmem:[%s3773_s2 + $0x168] sm:$0xff] }
 0x4c2   : > { %1218 = vmatpush.msrb.mxu1 %v1941_v35  ;;  %v1971_v35 = vld [vmem:[%s3773_s2 + $0xe8] sm:$0xff] }
 0x4c3   : > { %1241 = vmatpush.msra.mxu2 %v1942_v14  ;;  %1264 = vmatpush.msrb.mxu3 %v1943_v54  ;;  %v1972_v14 = vld [vmem:[%s3773_s2 + $0x160] sm:$0xff] }
 0x4c4   : > { %1219 = vmatpush.msrb.mxu1 %v1944_v3  ;;  %v1973_v54 = vld [vmem:[%s3773_s2 + $0xe0] sm:$0xff]  ;;  %v1974_v3 = vld [vmem:[%s3773_s2 + $0x158] sm:$0xff] }
 0x4c5   : > { %1242 = vmatpush.msra.mxu2 %v1945_v1  ;;  %1265 = vmatpush.msrb.mxu3 %v1946_v5  ;;  %v1975_v1 = vld [vmem:[%s3773_s2 + $0xd8] sm:$0xff]  ;;  %v1976_v5 = vld [vmem:[%s3773_s2 + $0xd0] sm:$0xff] }
 0x4c6   : > { %1220 = vmatpush.msrb.mxu1 %v1947_v17 }
 0x4c7   : > { %1136 = vmatmul.f32.gmra.mxu2 %v2999_v45  ;;  %1266 = vmatpush.msrb.mxu3 %v1948_v0  ;;  %v1835_v0 = vld [vmem:[%s3776_s5 + $0x120] sm:$0xff] }
 0x4c8   : > { %1159 = vmatmul.f32.gmra.mxu3 %v3251_v4  ;;  %1243 = vmatpush.msra.mxu2 %v1950_v6 }
 0x4c9   : > { %1221 = vmatpush.msrb.mxu1 %v1951_v8  ;;  %1267 = vmatpush.msrb.mxu3 %v1952_v10 }
 0x4ca   : > { %1244 = vmatpush.msra.mxu2 %v1953_v38 }
 0x4cb   : > { %1222 = vmatpush.msrb.mxu1 %v1954_v16  ;;  %1268 = vmatpush.msrb.mxu3 %v1955_v19  ;;  %v1977_v16 = vld [vmem:[%s3773_s2 + $0x78] sm:$0xff] }
 0x4cc   : > { %1245 = vmatpush.msra.mxu2 %v1956_v22  ;;  %v1978_v22 = vld [vmem:[%s3773_s2 + $0x70] sm:$0xff] }
 0x4cd   : > { %1223 = vmatpush.msrb.mxu1 %v1957_v25  ;;  %1269 = vmatpush.msrb.mxu3 %v1958_v44  ;;  %v1979_v44 = vld [vmem:[%s3773_s2 + $0x68] sm:$0xff] }
 0x4ce   : > { %1246 = vmatpush.msra.mxu2 %v1959_v15 }
 0x4cf   : > { %1224 = vmatpush.msrb.mxu1 %v1960_v18  ;;  %1270 = vmatpush.msrb.mxu3 %v1961_v46  ;;  %v1980_v18 = vld [vmem:[%s3773_s2 + $0x60] sm:$0xff]  ;;  %v1981_v46 = vld [vmem:[%s3773_s2 + $0x58] sm:$0xff] }
 0x4d0   : > { %1247 = vmatpush.msra.mxu2 %v1962_v21  ;;  %v1982_v21 = vld [vmem:[%s3773_s2 + $0x50] sm:$0xff] }
 0x4d1   : > { %1225 = vmatpush.msrb.mxu1 %v1963_v30  ;;  %1271 = vmatpush.msrb.mxu3 %v1964_v41  ;;  %v1983_v30 = vld [vmem:[%s3773_s2 + $0x48] sm:$0xff]  ;;  %v1984_v41 = vld [vmem:[%s3773_s2 + $0x40] sm:$0xff] }
 0x4d2   : > { %1248 = vmatpush.msra.mxu2 %v1965_v7  ;;  %v1985_v7 = vld [vmem:[%s3773_s2 + $0x38] sm:$0xff] }
 0x4d3   : > { %1377 = vmatpush.msra.mxu3 %v1966_v34  ;;  %v1986_v34 = vld [vmem:[%s3773_s2 + $0x30] sm:$0xff] }
 0x4d4   : > { %1354 = vmatpush.msrb.mxu2 %v1967_v42  ;;  %v1987_v42 = vld [vmem:[%s3773_s2 + $0x28] sm:$0xff] }
 0x4d5   : > { %1378 = vmatpush.msra.mxu3 %v1968_v29  ;;  %v1988_v29 = vld [vmem:[%s3773_s2 + $0x20] sm:$0xff] }
 0x4d6   : > { %1355 = vmatpush.msrb.mxu2 %v1969_v31  ;;  %v1989_v31 = vld [vmem:[%s3773_s2 + $0x18] sm:$0xff] }
 0x4d7   : > { %1379 = vmatpush.msra.mxu3 %v1970_v33  ;;  %v1990_v33 = vld [vmem:[%s3773_s2 + $0x10] sm:$0xff] }
 0x4d8   : > { %1356 = vmatpush.msrb.mxu2 %v1971_v35  ;;  %v1991_v35 = vld [vmem:[%s3773_s2 + $0x8] sm:$0xff] }
 0x4d9   : > { %1380 = vmatpush.msra.mxu3 %v1972_v14  ;;  %v1992_v14 = vld [vmem:[%s3773_s2] sm:$0xff] }
 0x4da   : > { %1357 = vmatpush.msrb.mxu2 %v1973_v54  ;;  %v1834_v54 = vld [vmem:[%s3776_s5 + $0x118] sm:$0xff] }
 0x4db   : > { %1381 = vmatpush.msra.mxu3 %v1974_v3  ;;  %v1833_v3 = vld [vmem:[%s3776_s5 + $0x110] sm:$0xff] }
 0x4dc   : > { %1358 = vmatpush.msrb.mxu2 %v1975_v1  ;;  %v1832_v1 = vld [vmem:[%s3776_s5 + $0x108] sm:$0xff] }
 0x4dd   : > { %1382 = vmatpush.msra.mxu3 %v2504_v63 }
 0x4de   : > { %1359 = vmatpush.msrb.mxu2 %v1976_v5  ;;  %v1831_v5 = vld [vmem:[%s3776_s5 + $0x100] sm:$0xff] }
 0x4df   : > { %1383 = vmatpush.msra.mxu3 %v2521_v26 }
 0x4e0   : > { %1360 = vmatpush.msrb.mxu2 %v3948_v37 }
 0x4e1   : > { %1384 = vmatpush.msra.mxu3 %v2539_v20 }
 0x4e2   : > { %1361 = vmatpush.msrb.mxu2 %v3949_v39  ;;  %v1840_v39 = vld [vmem:[%s3776_s5 + $0x148] sm:$0xff] }
 0x4e3   : > { %1385 = vmatpush.msra.mxu3 %v2558_v32  ;;  %v1846_v32 = vld [vmem:[%s3776_s5 + $0x178] sm:$0xff] }
 0x4e4   : > { %1362 = vmatpush.msrb.mxu2 %v3950_v24  ;;  %v1839_v24 = vld [vmem:[%s3776_s5 + $0x140] sm:$0xff] }
 0x4e5   : > { %1386 = vmatpush.msra.mxu3 %v2576_v13 }
 0x4e6   : > { %1363 = vmatpush.msrb.mxu2 %v3951_v47 }
 0x4e7   : > { %1387 = vmatpush.msra.mxu3 %v2593_v53  ;;  %v1845_v53 = vld [vmem:[%s3776_s5 + $0x170] sm:$0xff] }
 0x4e8   : > { %1364 = vmatpush.msrb.mxu2 %v3952_v58  ;;  %v1838_v58 = vld [vmem:[%s3776_s5 + $0x138] sm:$0xff] }
 0x4e9   : > { %1388 = vmatpush.msra.mxu3 %v2611_v11 }
 0x4ea   : > { %1365 = vmatpush.msrb.mxu2 %v3953_v60 }
 0x4eb   : > { %1389 = vmatpush.msra.mxu3 %v3904_v48  ;;  %v1844_v48 = vld [vmem:[%s3776_s5 + $0x168] sm:$0xff] }
 0x4ec   : > { %1366 = vmatpush.msrb.mxu2 %v3954_v40  ;;  %v1837_v40 = vld [vmem:[%s3776_s5 + $0x130] sm:$0xff] }
 0x4ed   : > { %1390 = vmatpush.msra.mxu3 %v3905_v49  ;;  %v1843_v49 = vld [vmem:[%s3776_s5 + $0x160] sm:$0xff] }
 0x4ee   : > { %1367 = vmatpush.msrb.mxu2 %v3955_v27 }
 0x4ef   : > { %1391 = vmatpush.msra.mxu3 %v3906_v56  ;;  %v1842_v56 = vld [vmem:[%s3776_s5 + $0x158] sm:$0xff] }
 0x4f0   : > { %1368 = vmatpush.msrb.mxu2 %v3956_v61 }
 0x4f1   : > { %1392 = vmatpush.msra.mxu3 %v3907_v57  ;;  %v1841_v57 = vld [vmem:[%s3776_s5 + $0x150] sm:$0xff] }
 0x4f2   : > { %1369 = vmatpush.msrb.mxu2 %v3957_v51  ;;  %v1836_v51 = vld [vmem:[%s3776_s5 + $0x128] sm:$0xff] }
 0x52c   : > { %v953_v13 = vpop.f32.mrf.mxu1 }
 0x532   : > { %v976_v47 = vpop.f32.mrf.mxu2 }
 0x533   : > { %v999_v11 = vpop.f32.mrf.mxu3 }
 0x534   : > { %v956_v20 = vpop.f32.mrf.mxu1 }
 0x535   : > { %1019 = vmatpush.msra.mxu0 %v956_v20 }
 0x537   : > { %1020 = vmatpush.msra.mxu0 %v953_v13 }
 0x538   : > { %1811 = vmatmul.msk.f32.vlgmr.msra.gmra.mxu0 %vm449_vm1, %v2424_v55 }
 0x53a   : > { %v979_v8 = vpop.f32.mrf.mxu2 }
 0x53b   : > { %v1002_v26 = vpop.f32.mrf.mxu3 }
 0x53c   : > { %1042 = vmatpush.msrb.mxu0 %v1002_v26 }
 0x53e   : > { %1043 = vmatpush.msrb.mxu0 %v999_v11 }
 0x540   : > { %1812 = vmatmul.msk.f32.gmra.mxu0 %vm449_vm1, %v2442_v36 }
 0x541   : > { %1180 = vmatpush.msra.mxu0 %v1846_v32 }
 0x543   : > { %1181 = vmatpush.msra.mxu0 %v1845_v53 }
 0x545   : > { %1182 = vmatpush.msra.mxu0 %v1844_v48 }
 0x547   : > { %1183 = vmatpush.msra.mxu0 %v1843_v49  ;;  %v1134_v49 = vpop.f32.mrf.mxu2 }
 0x548   : > { %1813 = vmatmul.msk.f32.vlgmr.msrb.gmra.mxu0 %vm449_vm1, %v2464_v59 }
 0x549   : > { %1184 = vmatpush.msra.mxu0 %v1842_v56  ;;  %v1157_v56 = vpop.f32.mrf.mxu3 }
 0x54b   : > { %1185 = vmatpush.msra.mxu0 %v1841_v57  ;;  %v3479_v57 = vld [vmem:[%s3778_s7] sm:$0xff] }
 0x54d   : > { %1186 = vmatpush.msra.mxu0 %v1840_v39 }
 0x54f   : > { %1187 = vmatpush.msra.mxu0 %v1839_v24 }
 0x550   : > { %1814 = vmatmul.msk.f32.gmra.mxu0 %vm449_vm1, %v2469_v50 }
 0x551   : > { %1188 = vmatpush.msra.mxu0 %v1838_v58  ;;  %v1160_v58 = vpop.f32.mrf.mxu3 }
 0x553   : > { %1189 = vmatpush.msra.mxu0 %v1837_v40 }
 0x555   : > { %1190 = vmatpush.msra.mxu0 %v1836_v51 }
 0x557   : > { %1191 = vmatpush.msra.mxu0 %v1835_v0 }
 0x559   : > { %1192 = vmatpush.msra.mxu0 %v1834_v54  ;;  %v1867_v54 = vld [vmem:[%s3777_s6 + $0xe0] sm:$0xff] }
 0x55b   : > { %1193 = vmatpush.msra.mxu0 %v1833_v3  ;;  %v1491_v3 = vld [vmem:[%s3777_s6 + $0x60] sm:$0xff] }
 0x55d   : > { %1194 = vmatpush.msra.mxu0 %v1832_v1  ;;  %v1866_v1 = vld [vmem:[%s3777_s6 + $0xd8] sm:$0xff] }
 0x55f   : > { %1195 = vmatpush.msra.mxu0 %v1831_v5  ;;  %v1490_v5 = vld [vmem:[%s3777_s6 + $0x58] sm:$0xff] }
 0x5b5   : > { %v1022_v63 = vpop.f32.mrf.mxu0 }
 0x5b6   : > { %v1023_v60 = vadd.f32 %v1022_v63, %v976_v47 }
 0x5bd   : > { %v1025_v37 = vpop.f32.mrf.mxu0 }
 0x5be   : > { %v1026_v10 = vadd.f32 %v1025_v37, %v979_v8  ;;  %v1205_v37 = vperm.slane %v3479_v57, 4 }
 0x5c5   : > { %v1045_v27 = vpop.f32.mrf.mxu0 }
 0x5c6   : > { %v1051_v61 = vadd.f32 %v1045_v27, %v1023_v60 }
 0x5c8   : > { %v1053_v17 = vadd.f32 %v1051_v61, %v2885_v23  ;;  %v1994_v61 = vld [vmem:[%s3774_s3 + $0x78] sm:$0xff] }
 0x5ca   : > { %v1055_v6 = vmax.f32 %v1053_v17, 0.0  ;;  %v1995_v17 = vld [vmem:[%s3774_s3 + $0x70] sm:$0xff] }
 0x5cc   : > { %1073 = vmatmul.f32.vlgmr.msra.gmra.mxu1 %v1055_v6  ;;  %v1996_v6 = vld [vmem:[%s3774_s3 + $0x68] sm:$0xff] }
 0x5cd   : > { %v1048_v38 = vpop.f32.mrf.mxu0  ;;  %1331 = vmatpush.msra.mxu1 %v1977_v16  ;;  %v1999_v16 = vld [vmem:[%s3774_s3 + $0x50] sm:$0xff] }
 0x5ce   : > { %v1052_v19 = vadd.f32 %v1048_v38, %v1026_v10  ;;  %v1997_v10 = vld [vmem:[%s3774_s3 + $0x60] sm:$0xff]  ;;  %v1998_v38 = vld [vmem:[%s3774_s3 + $0x58] sm:$0xff] }
 0x5cf   : > { %1332 = vmatpush.msra.mxu1 %v1978_v22  ;;  %v2001_v22 = vld [vmem:[%s3774_s3 + $0x40] sm:$0xff] }
 0x5d0   : > { %v1054_v25 = vadd.f32 %v1052_v19, %v2885_v23  ;;  %v2000_v19 = vld [vmem:[%s3774_s3 + $0x48] sm:$0xff] }
 0x5d1   : > { %1333 = vmatpush.msra.mxu1 %v1979_v44  ;;  %v2003_v44 = vld [vmem:[%s3774_s3 + $0x30] sm:$0xff] }
 0x5d2   : > { %v1056_v15 = vmax.f32 %v1054_v25, 0.0  ;;  %v2002_v25 = vld [vmem:[%s3774_s3 + $0x38] sm:$0xff] }
 0x5d3   : > { %1334 = vmatpush.msra.mxu1 %v1980_v18  ;;  %v2005_v18 = vld [vmem:[%s3774_s3 + $0x20] sm:$0xff] }
 0x5d4   : > { %1076 = vmatmul.f32.gmra.mxu1 %v1056_v15  ;;  %v2004_v15 = vld [vmem:[%s3774_s3 + $0x28] sm:$0xff] }
 0x5d5   : > { %1335 = vmatpush.msra.mxu1 %v1981_v46  ;;  %v2006_v46 = vld [vmem:[%s3774_s3 + $0x18] sm:$0xff] }
 0x5d7   : > { %1336 = vmatpush.msra.mxu1 %v1982_v21  ;;  %v2007_v21 = vld [vmem:[%s3774_s3 + $0x10] sm:$0xff] }
 0x5d9   : > { %1337 = vmatpush.msra.mxu1 %v1983_v30  ;;  %v2008_v30 = vld [vmem:[%s3774_s3 + $0x8] sm:$0xff] }
 0x5db   : > { %1338 = vmatpush.msra.mxu1 %v1984_v41 }
 0x5dd   : > { %1339 = vmatpush.msra.mxu1 %v1985_v7 }
 0x5df   : > { %1340 = vmatpush.msra.mxu1 %v1986_v34 }
 0x5e1   : > { %1341 = vmatpush.msra.mxu1 %v1987_v42 }
 0x5e3   : > { %1342 = vmatpush.msra.mxu1 %v1988_v29  ;;  %v1494_v29 = vld [vmem:[%s3777_s6 + $0x78] sm:$0xff] }
 0x5e5   : > { %1343 = vmatpush.msra.mxu1 %v1989_v31  ;;  %v1869_v31 = vld [vmem:[%s3777_s6 + $0xf0] sm:$0xff] }
 0x5e7   : > { %1344 = vmatpush.msra.mxu1 %v1990_v33  ;;  %v1493_v33 = vld [vmem:[%s3777_s6 + $0x70] sm:$0xff] }
 0x5e9   : > { %1345 = vmatpush.msra.mxu1 %v1991_v35  ;;  %v1868_v35 = vld [vmem:[%s3777_s6 + $0xe8] sm:$0xff] }
 0x5eb   : > { %1346 = vmatpush.msra.mxu1 %v1992_v14  ;;  %v1492_v14 = vld [vmem:[%s3777_s6 + $0x68] sm:$0xff] }
 0x649   : > { %v1074_v13 = vpop.f32.mrf.mxu1 }
 0x64a   : > { %v1075_v11 = vadd.f32 %v1074_v13, %v2976_v62  ;;  %v1865_v13 = vld [vmem:[%s3777_s6 + $0xd0] sm:$0xff] }
 0x64c   : > { %v3464_v20 = vadd.f32 %v1075_v11, %v3016_v2  ;;  %v1158_v2 = vadd.f32 %v1157_v56, %v1134_v49  ;;  %v1489_v11 = vld [vmem:[%s3777_s6 + $0x50] sm:$0xff]  ;;  %v1863_v49 = vld [vmem:[%s3777_s6 + $0xc0] sm:$0xff] }
 0x64d   : > { %v1487_v56 = vld [vmem:[%s3777_s6 + $0x40] sm:$0xff] }
 0x64e   : > { %v1082_v26 = vmax.f32 %v3464_v20, 0.0  ;;  %v1900_v20 = vld [vmem:[%s3777_s6 + $0x1e8] sm:$0xff] }
 0x650   : > { %1196 = vmatmul.f32.vlgmr.msra.gmra.mxu0 %v1082_v26 }
 0x651   : > { %v1077_v32 = vpop.f32.mrf.mxu1 }
 0x652   : > { %v1078_v53 = vadd.f32 %v1077_v32, %v2976_v62  ;;  %v1864_v32 = vld [vmem:[%s3777_s6 + $0xc8] sm:$0xff] }
 0x654   : > { %v3471_v63 = vadd.f32 %v1078_v53, %v3021_v12  ;;  %v1137_v12 = vpop.f32.mrf.mxu2  ;;  %v1488_v53 = vld [vmem:[%s3777_s6 + $0x48] sm:$0xff] }
 0x655   : > { %v1161_v40 = vadd.f32 %v1160_v58, %v1137_v12  ;;  %v1484_v12 = vld [vmem:[%s3777_s6 + $0x28] sm:$0xff]  ;;  %v1859_v58 = vld [vmem:[%s3777_s6 + $0xa0] sm:$0xff] }
 0x656   : > { %v1083_v48 = vmax.f32 %v3471_v63, 0.0  ;;  %v1899_v63 = vld [vmem:[%s3777_s6 + $0x1e0] sm:$0xff] }
 0x658   : > { %1199 = vmatmul.f32.gmra.mxu0 %v1083_v48 }
 0x6cd   : > { %v1197_v39 = vpop.f32.mrf.mxu0 }
 0x6ce   : > { %v1203_v24 = vadd.f32 %v1197_v39, %v1158_v2  ;;  %v1862_v2 = vld [vmem:[%s3777_s6 + $0xb8] sm:$0xff]  ;;  %v1861_v39 = vld [vmem:[%s3777_s6 + $0xb0] sm:$0xff] }
 0x6d0   : > { %v1206_v47 = vadd.f32 %v1205_v37, %v1203_v24  ;;  %v1485_v24 = vld [vmem:[%s3777_s6 + $0x30] sm:$0xff] }
 0x6d2   : > { %v3482_v60 = vmax.f32 %v1206_v47, 0.0  ;;  %v1860_v47 = vld [vmem:[%s3777_s6 + $0xa8] sm:$0xff] }
 0x6d4   : > { %1226 = vmatmul.f32.vlgmr.msrb.gmra.mxu1 %v3482_v60  ;;  %1249 = vmatmul.f32.vlgmr.msra.gmra.mxu2 %v3482_v60 }
 0x6d5   : > { %1272 = vmatmul.f32.vlgmr.msrb.gmra.mxu3 %v3482_v60  ;;  %v1200_v27 = vpop.f32.mrf.mxu0  ;;  %1452 = vmatpush.msrb.mxu1 %v1994_v61  ;;  %v1858_v61 = vld [vmem:[%s3777_s6 + $0x98] sm:$0xff] }
 0x6d6   : > { %v1204_v51 = vadd.f32 %v1200_v27, %v1161_v40  ;;  %1535 = vmatpush.msrb.mxu3 %v1494_v29  ;;  %v1483_v40 = vld [vmem:[%s3777_s6 + $0x20] sm:$0xff] }
 0x6d7   : > { %1453 = vmatpush.msrb.mxu1 %v1995_v17  ;;  %v1857_v17 = vld [vmem:[%s3777_s6 + $0x90] sm:$0xff] }
 0x6d8   : > { %v1207_v0 = vadd.f32 %v1205_v37, %v1204_v51  ;;  %1536 = vmatpush.msrb.mxu3 %v1493_v33  ;;  %v1486_v37 = vld [vmem:[%s3777_s6 + $0x38] sm:$0xff]  ;;  %v1881_v33 = vld [vmem:[%s3777_s6 + $0x150] sm:$0xff] }
 0x6d9   : > { %1454 = vmatpush.msrb.mxu1 %v1996_v6  ;;  %v1482_v51 = vld [vmem:[%s3777_s6 + $0x18] sm:$0xff]  ;;  %v1856_v6 = vld [vmem:[%s3777_s6 + $0x88] sm:$0xff] }
 0x6da   : > { %v3496_v8 = vmax.f32 %v1207_v0, 0.0  ;;  %1537 = vmatpush.msrb.mxu3 %v1492_v14  ;;  %v1481_v0 = vld [vmem:[%s3777_s6 + $0x10] sm:$0xff]  ;;  %v1878_v14 = vld [vmem:[%s3777_s6 + $0x138] sm:$0xff] }
 0x6db   : > { %1455 = vmatpush.msrb.mxu1 %v1997_v10  ;;  %v1480_v10 = vld [vmem:[%s3777_s6 + $0x8] sm:$0xff] }
 0x6dc   : > { %1229 = vmatmul.f32.gmra.mxu1 %v3496_v8  ;;  %1252 = vmatmul.f32.gmra.mxu2 %v3496_v8 }
 0x6dd   : > { %1275 = vmatmul.f32.gmra.mxu3 %v3496_v8  ;;  %1456 = vmatpush.msrb.mxu1 %v1998_v38  ;;  %v1855_v38 = vld [vmem:[%s3777_s6 + $0x80] sm:$0xff] }
 0x6de   : > { %1538 = vmatpush.msrb.mxu3 %v1491_v3  ;;  %v1875_v3 = vld [vmem:[%s3777_s6 + $0x120] sm:$0xff] }
 0x6df   : > { %1457 = vmatpush.msrb.mxu1 %v1999_v16  ;;  %v1479_v16 = vld [vmem:[%s3777_s6] sm:$0xff] }
 0x6e0   : > { %1539 = vmatpush.msrb.mxu3 %v1490_v5  ;;  %v1873_v5 = vld [vmem:[%s3777_s6 + $0x110] sm:$0xff] }
 0x6e1   : > { %1458 = vmatpush.msrb.mxu1 %v2000_v19 }
 0x6e2   : > { %1540 = vmatpush.msrb.mxu3 %v1489_v11 }
 0x6e3   : > { %1459 = vmatpush.msrb.mxu1 %v2001_v22 }
 0x6e4   : > { %1541 = vmatpush.msrb.mxu3 %v1488_v53 }
 0x6e5   : > { %1460 = vmatpush.msrb.mxu1 %v2002_v25 }
 0x6e6   : > { %1542 = vmatpush.msrb.mxu3 %v1487_v56  ;;  %v1902_v56 = vld [vmem:[%s3777_s6 + $0x1f8] sm:$0xff] }
 0x6e7   : > { %1461 = vmatpush.msrb.mxu1 %v2003_v44 }
 0x6e8   : > { %1543 = vmatpush.msrb.mxu3 %v1486_v37 }
 0x6e9   : > { %1462 = vmatpush.msrb.mxu1 %v2004_v15 }
 0x6ea   : > { %1544 = vmatpush.msrb.mxu3 %v1485_v24  ;;  %v1898_v24 = vld [vmem:[%s3777_s6 + $0x1d8] sm:$0xff] }
 0x6eb   : > { %1463 = vmatpush.msrb.mxu1 %v2005_v18 }
 0x6ec   : > { %1545 = vmatpush.msrb.mxu3 %v1484_v12 }
 0x6ed   : > { %1464 = vmatpush.msrb.mxu1 %v2006_v46 }
 0x6ee   : > { %1546 = vmatpush.msrb.mxu3 %v1483_v40 }
 0x6ef   : > { %1465 = vmatpush.msrb.mxu1 %v2007_v21 }
 0x6f0   : > { %1547 = vmatpush.msrb.mxu3 %v1482_v51 }
 0x6f1   : > { %1466 = vmatpush.msrb.mxu1 %v2008_v30 }
 0x6f2   : > { %1548 = vmatpush.msrb.mxu3 %v1481_v0 }
 0x6f3   : > { %1467 = vmatpush.msrb.mxu1 %v2816_v28  ;;  %v1870_v28 = vld [vmem:[%s3777_s6 + $0xf8] sm:$0xff] }
 0x6f4   : > { %1512 = vmatpush.msra.mxu2 %v1870_v28  ;;  %1549 = vmatpush.msrb.mxu3 %v1480_v10  ;;  %v1893_v10 = vld [vmem:[%s3777_s6 + $0x1b0] sm:$0xff] }
 0x6f6   : > { %1513 = vmatpush.msra.mxu2 %v1869_v31  ;;  %1550 = vmatpush.msrb.mxu3 %v1479_v16  ;;  %v1890_v16 = vld [vmem:[%s3777_s6 + $0x198] sm:$0xff] }
 0x6f8   : > { %1514 = vmatpush.msra.mxu2 %v1868_v35  ;;  %v1879_v35 = vld [vmem:[%s3777_s6 + $0x140] sm:$0xff] }
 0x6fa   : > { %1515 = vmatpush.msra.mxu2 %v1867_v54  ;;  %v1877_v54 = vld [vmem:[%s3777_s6 + $0x130] sm:$0xff] }
 0x6fc   : > { %1516 = vmatpush.msra.mxu2 %v1866_v1  ;;  %v1874_v1 = vld [vmem:[%s3777_s6 + $0x118] sm:$0xff] }
 0x6fe   : > { %1517 = vmatpush.msra.mxu2 %v1865_v13  ;;  %v1871_v13 = vld [vmem:[%s3777_s6 + $0x100] sm:$0xff] }
 0x700   : > { %1518 = vmatpush.msra.mxu2 %v1864_v32 }
 0x702   : > { %1519 = vmatpush.msra.mxu2 %v1863_v49 }
 0x704   : > { %1520 = vmatpush.msra.mxu2 %v1862_v2  ;;  %v1901_v2 = vld [vmem:[%s3777_s6 + $0x1f0] sm:$0xff] }
 0x706   : > { %1521 = vmatpush.msra.mxu2 %v1861_v39 }
 0x708   : > { %1522 = vmatpush.msra.mxu2 %v1860_v47 }
 0x70a   : > { %1523 = vmatpush.msra.mxu2 %v1859_v58  ;;  %v1897_v58 = vld [vmem:[%s3777_s6 + $0x1d0] sm:$0xff] }
 0x70c   : > { %1524 = vmatpush.msra.mxu2 %v1858_v61  ;;  %v1896_v61 = vld [vmem:[%s3777_s6 + $0x1c8] sm:$0xff] }
 0x70e   : > { %1525 = vmatpush.msra.mxu2 %v1857_v17  ;;  %v1895_v17 = vld [vmem:[%s3777_s6 + $0x1c0] sm:$0xff] }
 0x710   : > { %1526 = vmatpush.msra.mxu2 %v1856_v6  ;;  %v1894_v6 = vld [vmem:[%s3777_s6 + $0x1b8] sm:$0xff] }
 0x712   : > { %1527 = vmatpush.msra.mxu2 %v1855_v38  ;;  %v1891_v38 = vld [vmem:[%s3777_s6 + $0x1a0] sm:$0xff] }
 0x751   : > { %v1227_v41 = vpop.f32.mrf.mxu1 }
 0x757   : > { %v1250_v22 = vpop.f32.mrf.mxu2 }
 0x758   : > { %v1273_v7 = vpop.f32.mrf.mxu3 }
 0x759   : > { %v1230_v34 = vpop.f32.mrf.mxu1 }
 0x75a   : > { %1293 = vmatpush.msrb.mxu0 %v1230_v34 }
 0x75c   : > { %1294 = vmatpush.msrb.mxu0 %v1227_v41 }
 0x75d   : > { %1847 = vmatmul.msk.f32.vlgmr.msrb.gmra.mxu0 %vm449_vm1, %v2424_v55 }
 0x75f   : > { %v1253_v21 = vpop.f32.mrf.mxu2 }
 0x760   : > { %v1276_v42 = vpop.f32.mrf.mxu3 }
 0x761   : > { %1316 = vmatpush.msra.mxu0 %v1276_v42 }
 0x763   : > { %1317 = vmatpush.msra.mxu0 %v1273_v7 }
 0x765   : > { %1848 = vmatmul.msk.f32.gmra.mxu0 %vm449_vm1, %v2442_v36 }
 0x76d   : > { %1849 = vmatmul.msk.f32.vlgmr.msra.gmra.mxu0 %vm449_vm1, %v2464_v59 }
 0x775   : > { %1850 = vmatmul.msk.f32.gmra.mxu0 %vm449_vm1, %v2469_v50 }
 0x7da   : > { %v1296_v27 = vpop.f32.mrf.mxu0 }
 0x7db   : > { %v1297_v25 = vadd.f32 %v1296_v27, %v1250_v22  ;;  %v1888_v22 = vld [vmem:[%s3777_s6 + $0x188] sm:$0xff] }
 0x7e2   : > { %v1299_v19 = vpop.f32.mrf.mxu0 }
 0x7e3   : > { %v1300_v30 = vadd.f32 %v1299_v19, %v1253_v21  ;;  %v1889_v19 = vld [vmem:[%s3777_s6 + $0x190] sm:$0xff] }
 0x7ea   : > { %v1319_v44 = vpop.f32.mrf.mxu0 }
 0x7eb   : > { %v1325_v15 = vadd.f32 %v1319_v44, %v1297_v25  ;;  %v1887_v25 = vld [vmem:[%s3777_s6 + $0x180] sm:$0xff] }
 0x7ed   : > { %v1327_v18 = vadd.f32 %v1325_v15, %v2695_v52 }
 0x7ef   : > { %v1329_v46 = vmax.f32 %v1327_v18, 0.0 }
 0x7f1   : > { %1347 = vmatmul.f32.vlgmr.msra.gmra.mxu1 %v1329_v46  ;;  %1370 = vmatmul.f32.vlgmr.msrb.gmra.mxu2 %v1329_v46 }
 0x7f2   : > { %1393 = vmatmul.f32.vlgmr.msra.gmra.mxu3 %v1329_v46  ;;  %v1322_v41 = vpop.f32.mrf.mxu0  ;;  %1617 = vmatpush.msra.mxu1 %v1902_v56 }
 0x7f3   : > { %v1326_v7 = vadd.f32 %v1322_v41, %v1300_v30 }
 0x7f4   : > { %1618 = vmatpush.msra.mxu1 %v1901_v2 }
 0x7f5   : > { %v1328_v34 = vadd.f32 %v1326_v7, %v2695_v52 }
 0x7f6   : > { %1619 = vmatpush.msra.mxu1 %v1900_v20 }
 0x7f7   : > { %v1330_v42 = vmax.f32 %v1328_v34, 0.0 }
 0x7f8   : > { %1620 = vmatpush.msra.mxu1 %v1899_v63 }
 0x7f9   : > { %1350 = vmatmul.f32.gmra.mxu1 %v1330_v42  ;;  %1373 = vmatmul.f32.gmra.mxu2 %v1330_v42 }
 0x7fa   : > { %1396 = vmatmul.f32.gmra.mxu3 %v1330_v42  ;;  %1621 = vmatpush.msra.mxu1 %v1898_v24 }
 0x7fc   : > { %1622 = vmatpush.msra.mxu1 %v1897_v58 }
 0x7fe   : > { %1623 = vmatpush.msra.mxu1 %v1896_v61 }
 0x800   : > { %1624 = vmatpush.msra.mxu1 %v1895_v17 }
 0x801   : > { %1528 = vmatmul.f32.vlgmr.msra.gmra.mxu2 %v2988_v43  ;;  %v1886_v43 = vld [vmem:[%s3777_s6 + $0x178] sm:$0xff] }
 0x802   : > { %1551 = vmatmul.f32.vlgmr.msrb.gmra.mxu3 %v3213_v9  ;;  %v1884_v9 = vld [vmem:[%s3777_s6 + $0x168] sm:$0xff]  ;;  %1625 = vmatpush.msra.mxu1 %v1894_v6 }
 0x804   : > { %1626 = vmatpush.msra.mxu1 %v1893_v10 }
 0x809   : > { %1531 = vmatmul.f32.gmra.mxu2 %v2999_v45  ;;  %v1885_v45 = vld [vmem:[%s3777_s6 + $0x170] sm:$0xff] }
 0x80a   : > { %1554 = vmatmul.f32.gmra.mxu3 %v3251_v4  ;;  %v1882_v4 = vld [vmem:[%s3777_s6 + $0x158] sm:$0xff] }
 0x86e   : > { %v1348_v28 = vpop.f32.mrf.mxu1 }
 0x874   : > { %v1371_v53 = vpop.f32.mrf.mxu2 }
 0x875   : > { %v1394_v29 = vpop.f32.mrf.mxu3 }
 0x876   : > { %v1351_v31 = vpop.f32.mrf.mxu1 }
 0x877   : > { %1414 = vmatpush.msrb.mxu0 %v1351_v31 }
 0x879   : > { %1415 = vmatpush.msrb.mxu0 %v1348_v28 }
 0x87a   : > { %1851 = vmatmul.msk.f32.vlgmr.msrb.gmra.mxu0 %vm449_vm1, %v2424_v55  ;;  %v1883_v55 = vld [vmem:[%s3777_s6 + $0x160] sm:$0xff] }
 0x87c   : > { %v1374_v47 = vpop.f32.mrf.mxu2 }
 0x87d   : > { %v1397_v52 = vpop.f32.mrf.mxu3 }
 0x87e   : > { %1437 = vmatpush.msra.mxu0 %v1397_v52  ;;  %v1642_v52 = vperm.slane %v3479_v57, 5 }
 0x880   : > { %1438 = vmatpush.msra.mxu0 %v1394_v29 }
 0x882   : > { %1575 = vmatpush.msrb.mxu0 %v1886_v43 }
 0x883   : > { %1852 = vmatmul.msk.f32.gmra.mxu0 %vm449_vm1, %v2442_v36  ;;  %v1880_v36 = vld [vmem:[%s3777_s6 + $0x148] sm:$0xff] }
 0x884   : > { %1576 = vmatpush.msrb.mxu0 %v1885_v45  ;;  %v1529_v34 = vpop.f32.mrf.mxu2 }
 0x885   : > { %v1552_v42 = vpop.f32.mrf.mxu3 }
 0x886   : > { %1577 = vmatpush.msrb.mxu0 %v1884_v9  ;;  %v1553_v29 = vadd.f32 %v1552_v42, %v1529_v34 }
 0x888   : > { %1578 = vmatpush.msrb.mxu0 %v1883_v55 }
 0x88a   : > { %1579 = vmatpush.msrb.mxu0 %v1882_v4 }
 0x88b   : > { %1853 = vmatmul.msk.f32.vlgmr.msra.gmra.mxu0 %vm449_vm1, %v2464_v59  ;;  %v1876_v59 = vld [vmem:[%s3777_s6 + $0x128] sm:$0xff] }
 0x88c   : > { %1580 = vmatpush.msrb.mxu0 %v1881_v33 }
 0x88d   : > { %v1555_v9 = vpop.f32.mrf.mxu3 }
 0x88e   : > { %1581 = vmatpush.msrb.mxu0 %v1880_v36 }
 0x890   : > { %1582 = vmatpush.msrb.mxu0 %v1879_v35 }
 0x892   : > { %1583 = vmatpush.msrb.mxu0 %v1878_v14 }
 0x893   : > { %1854 = vmatmul.msk.f32.gmra.mxu0 %vm449_vm1, %v2469_v50  ;;  %v1872_v50 = vld [vmem:[%s3777_s6 + $0x108] sm:$0xff] }
 0x894   : > { %1584 = vmatpush.msrb.mxu0 %v1877_v54 }
 0x896   : > { %1585 = vmatpush.msrb.mxu0 %v1876_v59 }
 0x898   : > { %1586 = vmatpush.msrb.mxu0 %v1875_v3 }
 0x89a   : > { %1587 = vmatpush.msrb.mxu0 %v1874_v1 }
 0x89c   : > { %1588 = vmatpush.msrb.mxu0 %v1873_v5 }
 0x89e   : > { %1589 = vmatpush.msrb.mxu0 %v1872_v50 }
 0x8a0   : > { %1590 = vmatpush.msrb.mxu0 %v1871_v13 }
 0x8a1   : > { %1591 = vmatmul.f32.vlgmr.msrb.gmra.mxu0 %v1082_v26 }
 0x8a9   : > { %1594 = vmatmul.f32.gmra.mxu0 %v1083_v48 }
 0x8f7   : > { %v1417_v11 = vpop.f32.mrf.mxu0 }
 0x8f8   : > { %v1418_v49 = vadd.f32 %v1417_v11, %v1371_v53 }
 0x900   : > { %v1420_v32 = vpop.f32.mrf.mxu0 }
 0x901   : > { %v1421_v12 = vadd.f32 %v1420_v32, %v1374_v47 }
 0x908   : > { %v1440_v37 = vpop.f32.mrf.mxu0 }
 0x909   : > { %v1446_v39 = vadd.f32 %v1440_v37, %v1418_v49 }
 0x90b   : > { %v1448_v26 = vadd.f32 %v1446_v39, %v2885_v23 }
 0x90d   : > { %v1450_v48 = vmax.f32 %v1448_v26, 0.0 }
 0x90f   : > { %1468 = vmatmul.f32.vlgmr.msrb.gmra.mxu1 %v1450_v48 }
 0x910   : > { %v1443_v40 = vpop.f32.mrf.mxu0 }
 0x911   : > { %v1447_v27 = vadd.f32 %v1443_v40, %v1421_v12 }
 0x913   : > { %v1449_v51 = vadd.f32 %v1447_v27, %v2885_v23  ;;  %v1892_v23 = vld [vmem:[%s3777_s6 + $0x1a8] sm:$0xff] }
 0x914   : > { %1627 = vmatpush.msra.mxu1 %v1892_v23 }
 0x915   : > { %v1451_v0 = vmax.f32 %v1449_v51, 0.0 }
 0x916   : > { %1628 = vmatpush.msra.mxu1 %v1891_v38 }
 0x917   : > { %1471 = vmatmul.f32.gmra.mxu1 %v1451_v0 }
 0x918   : > { %1629 = vmatpush.msra.mxu1 %v1890_v16 }
 0x91a   : > { %1630 = vmatpush.msra.mxu1 %v1889_v19 }
 0x91c   : > { %1631 = vmatpush.msra.mxu1 %v1888_v22 }
 0x91e   : > { %1632 = vmatpush.msra.mxu1 %v1887_v25  ;;  %v1592_v28 = vpop.f32.mrf.mxu0 }
 0x91f   : > { %v1598_v31 = vadd.f32 %v1592_v28, %v1553_v29 }
 0x926   : > { %v1595_v4 = vpop.f32.mrf.mxu0 }
 0x98c   : > { %v1469_v44 = vpop.f32.mrf.mxu1 }
 0x98d   : > { %v1470_v15 = vadd.f32 %v1469_v44, %v2976_v62 }
 0x98f   : > { %v1475_v18 = vadd.f32 %v1470_v15, %v3482_v60  ;;  %v1532_v60 = vpop.f32.mrf.mxu2 }
 0x991   : > { %v1477_v46 = vmax.f32 %v1475_v18, 0.0 }
 0x993   : > { %1633 = vmatmul.f32.vlgmr.msra.gmra.mxu1 %v1477_v46 }
 0x994   : > { %v1472_v21 = vpop.f32.mrf.mxu1 }
 0x995   : > { %v1473_v30 = vadd.f32 %v1472_v21, %v2976_v62  ;;  %v1556_v62 = vadd.f32 %v1555_v9, %v1532_v60 }
 0x997   : > { %v1476_v41 = vadd.f32 %v1473_v30, %v3496_v8  ;;  %v1599_v33 = vadd.f32 %v1595_v4, %v1556_v62 }
 0x999   : > { %v1478_v7 = vmax.f32 %v1476_v41, 0.0 }
 0x99b   : > { %1636 = vmatmul.f32.gmra.mxu1 %v1478_v7 }
 0xa10   : > { %v1634_v43 = vpop.f32.mrf.mxu1 }
 0xa11   : > { %v1640_v45 = vadd.f32 %v1634_v43, %v1598_v31 }
 0xa13   : > { %v1643_v55 = vadd.f32 %v1642_v52, %v1640_v45 }
 0xa15   : > { %v1645_v8 = vmax.f32 %v1643_v55, 0.0 }
 0xa17   : > { %1647 = vst [vmem:[%s305_s21] sm:$0xff] %v1645_v8 }
 0xa18   : > { %v1637_v36 = vpop.f32.mrf.mxu1 }
 0xa19   : > { %v1641_v35 = vadd.f32 %v1637_v36, %v1599_v33 }
 0xa1b   : > { %v1644_v14 = vadd.f32 %v1642_v52, %v1641_v35 }
 0xa1d   : > { %v1646_v54 = vmax.f32 %v1644_v14, 0.0 }
 0xa1f   : > { %1648 = vst [vmem:[%s305_s21 + $0x8] sm:$0xff] %v1646_v54 }
 0xa20 PF: > { %s18_s27 = sadd.s32 1, %s2015_s27  }
 0xa21   : > { %p15_p4 = scmp.ge.s32.totalorder %s18_s27, 4  }
 0xa23   :  { %17 = sbr.rel (!%p15_p4) target bundleno = 1 (0x1), region = 92 }

</bundles_post_ra>
